<compile_context>
chip_gen: v7x
topology: tpu7x:2x2x1
jax: 0.10.0
libtpu: 0.0.40
codegen_flags: <defaults>
</compile_context>

<pallas_src>
import functools

import jax
import jax.numpy as jnp
from jax import lax
from jax.experimental import pallas as pl
from jax.experimental.pallas import tpu as pltpu  # noqa: F401  (imported per template)

EPS = 1e-5


# ----------------------------------------------------------------------------
# BatchNorm1d (training mode) helpers
# ----------------------------------------------------------------------------
def _batchnorm_train_ref(x, gamma, beta):
    """Two-pass BN (matches PyTorch training-mode math) - reference only."""
    mu = jnp.mean(x, axis=0, keepdims=True)
    var = jnp.mean((x - mu) * (x - mu), axis=0, keepdims=True)
    return (x - mu) * lax.rsqrt(var + EPS) * gamma + beta


def _batchnorm_train_mxu(x, inv_rows, gamma, beta):
    """BN with batch statistics computed on the MXU.

    inv_rows is a [1, R] row filled with 1/R.  One matmul produces both mu and
    E[x^2] per lane column; var = E[x^2] - mu^2 (biased), clamped at 0 against
    cancellation.  With graphs packed on lanes this is per-graph/per-channel.
    """
    c = x.shape[1]
    stats = jnp.dot(inv_rows, jnp.concatenate([x, x * x], axis=-1),
                    preferred_element_type=jnp.float32)        # [1, 2c]
    mu = stats[:, :c]
    var = jnp.maximum(stats[:, c:] - mu * mu, 0.0)
    return (x - mu) * lax.rsqrt(var + EPS) * gamma + beta


# ----------------------------------------------------------------------------
# Kernel: one invocation == full forward pass for ALL B graphs (lanes-packed)
# ----------------------------------------------------------------------------
def _flocking_kernel(lane_c,
                     h_in_ref, gather_ref, scatter_t_ref, inv_cnt_ref,
                     w_in_ref,
                     msg_w_ref, msg_g_ref, msg_be_ref,
                     msg_wout_ref, msg_bout_ref,
                     upd_w_ref, upd_g_ref, upd_be_ref,
                     w_pred_ref, b_pred_ref,
                     out_ref):
    f32 = jnp.float32
    n_edges = gather_ref.shape[0]
    n_nodes = scatter_t_ref.shape[0]
    inv_e = jnp.full((1, n_edges), 1.0 / n_edges, f32)   # 1/E row for edge BNs
    inv_n = jnp.full((1, n_nodes), 1.0 / n_nodes, f32)   # 1/N row for node BNs

    # ---- lin_in (bias dropped: it cancels exactly in h_i - h_j and h is not
    # otherwise used by the module's update()) --------------------------------
    h = jnp.dot(h_in_ref[...], w_in_ref[...],
                preferred_element_type=f32)                       # [N, B*emb]

    # ---- message gather: h_dif = h_i - h_j = (oh_dst - oh_src) @ h ----------
    h_dif = jnp.dot(gather_ref[...], h, preferred_element_type=f32)  # [E, B*emb]

    # ---- mlp_msg: (Linear, BN, Tanh) x3 then Linear(emb -> 2*emb) -----------
    # Pre-BN Linear biases are omitted: BN(xW+b) == BN(xW) exactly.
    x = h_dif
    for k in range(3):
        x = jnp.dot(x, msg_w_ref[k], preferred_element_type=f32)
        x = _batchnorm_train_mxu(x, inv_e, msg_g_ref[k], msg_be_ref[k])
        x = jnp.tanh(x)
    msg = jnp.dot(x, msg_wout_ref[...],
                  preferred_element_type=f32) + msg_bout_ref[...]  # [E, 2*B*emb]

    # ---- fused aggregate: one scatter matmul, 128-aligned add/mean split ----
    agg = jnp.dot(scatter_t_ref[...], msg, preferred_element_type=f32)  # [N, 2*B*emb]
    y = agg[:, :lane_c] + agg[:, lane_c:] * inv_cnt_ref[...]            # [N, B*emb]

    # ---- mlp_upd: (Linear, BN, Tanh) x4 (pre-BN biases omitted) -------------
    for k in range(4):
        y = jnp.dot(y, upd_w_ref[k], preferred_element_type=f32)
        y = _batchnorm_train_mxu(y, inv_n, upd_g_ref[k], upd_be_ref[k])
        y = jnp.tanh(y)

    # ---- lin_pred ------------------------------------------------------------
    out_ref[...] = (jnp.dot(y, w_pred_ref[...], preferred_element_type=f32)
                    + b_pred_ref[...])


# ----------------------------------------------------------------------------
# Wrapper
# ----------------------------------------------------------------------------
def flocking_forward(pos, vel, edge_index, params):
    """pos, vel: [B, N, 2] (or [N, 2]) f32; edge_index: [2, E] int32 (shared)."""
    squeeze = pos.ndim == 2
    if squeeze:
        pos, vel = pos[None], vel[None]

    B, N, _ = pos.shape
    E = edge_index.shape[1]
    in_dim = params["w_in"].shape[0]
    emb = params["w_in"].shape[1]
    out_dim = params["w_pred"].shape[1]
    C = B * emb                      # packed lane width (pick B*emb % 128 == 0)

    f32 = jnp.float32
    eye_b = jnp.eye(B, dtype=f32)

    def blk(w):                      # [cin, cout] -> block-diag [B*cin, B*cout]
        return jnp.kron(eye_b, w.astype(f32))

    def tile_lanes(v):               # [..., c] -> [..., B*c] (per-graph copy)
        return jnp.tile(v.astype(f32), (1,) * (v.ndim - 1) + (B,))

    # ---- graphs-on-lanes input packing: [N, B*in_dim] ------------------------
    h_in = jnp.concatenate([pos, vel], axis=-1).astype(f32)            # [B, N, 4]
    h_in = jnp.transpose(h_in, (1, 0, 2)).reshape(N, B * in_dim)

    # ---- static-graph incidence precompute (shared across graphs) ------------
    # TODO(synk): for large graphs (N~1k+, esp. v7x 64MiB VMEM) replace the dense
    # [E,N]/[N,E] incidence matmuls with a scalar-prefetch edge-list gather path.
    src = edge_index[0].astype(jnp.int32)
    dst = edge_index[1].astype(jnp.int32)
    oh_src = jax.nn.one_hot(src, N, dtype=f32)                         # [E, N]
    oh_dst = jax.nn.one_hot(dst, N, dtype=f32)                         # [E, N]
    gather = oh_dst - oh_src                                           # [E, N]
    scatter_t = oh_dst.T                                               # [N, E]
    count = jnp.sum(oh_dst, axis=0)[:, None]                           # [N, 1]
    try:  # documented semantics assumption (torch_scatter output size == N)
        assert bool(jnp.all(count > 0)), "every node must receive >= 1 message"
    except jax.errors.ConcretizationTypeError:
        pass                                                           # under jit
    inv_cnt = 1.0 / jnp.maximum(count, 1.0)                            # [N, 1]

    # ---- block-diagonal weights / lane-tiled biases & BN params --------------
    w_in_blk = blk(params["w_in"])
    msg_w_blk = jnp.stack([blk(params["msg_w"][k]) for k in range(3)])
    msg_g = jnp.stack([tile_lanes(params["msg_g"][k]) for k in range(3)])
    msg_be = jnp.stack([tile_lanes(params["msg_be"][k]) for k in range(3)])
    # msg_wout packed as [all add-halves | all mean-halves] -> 128-aligned split
    w_add, w_mean = params["msg_wout"][:, :emb], params["msg_wout"][:, emb:]
    b_add, b_mean = params["msg_bout"][:, :emb], params["msg_bout"][:, emb:]
    msg_wout_pk = jnp.concatenate([blk(w_add), blk(w_mean)], axis=1)
    msg_bout_pk = jnp.concatenate([tile_lanes(b_add), tile_lanes(b_mean)], axis=1)
    upd_w_blk = jnp.stack([blk(params["upd_w"][k]) for k in range(4)])
    upd_g = jnp.stack([tile_lanes(params["upd_g"][k]) for k in range(4)])
    upd_be = jnp.stack([tile_lanes(params["upd_be"][k]) for k in range(4)])
    w_pred_blk = blk(params["w_pred"])
    b_pred_pk = tile_lanes(params["b_pred"])

    args = (h_in, gather, scatter_t, inv_cnt, w_in_blk,
            msg_w_blk, msg_g, msg_be, msg_wout_pk, msg_bout_pk,
            upd_w_blk, upd_g, upd_be, w_pred_blk, b_pred_pk)

    # ---- tiny, accurate cost estimate so XLA doesn't serialize around us -----
    flops = 2 * (N * (B * in_dim) * C          # lin_in
                 + E * N * C                   # gather
                 + 3 * E * C * C               # msg hidden layers
                 + E * C * (2 * C)             # msg_wout
                 + N * E * (2 * C)             # fused scatter
                 + 4 * N * C * C               # upd hidden layers
                 + N * C * (B * out_dim)       # lin_pred
                 + 3 * E * (2 * C) + 4 * N * (2 * C))   # BN stats matmuls
    transcendentals = 3 * E * C + 4 * N * C + 7 * C     # tanh + rsqrt (approx)
    bytes_accessed = sum(int(a.size) * 4 for a in args) + N * B * out_dim * 4

    out = pl.pallas_call(
        functools.partial(_flocking_kernel, C),
        out_shape=jax.ShapeDtypeStruct((N, B * out_dim), f32),
        cost_estimate=pl.CostEstimate(flops=int(flops),
                                      transcendentals=int(transcendentals),
                                      bytes_accessed=int(bytes_accessed)),
    )(*args)

    out = out.reshape(N, B, out_dim).transpose(1, 0, 2)                # [B, N, out]
    return out[0] if squeeze else out


# ----------------------------------------------------------------------------
# Deterministic synthetic parameters matching the module's shapes / sharing
# ----------------------------------------------------------------------------
def init_params(key, emb_dim=4, out_dim=2, in_dim=4):
    ks = jax.random.split(key, 16)

    def lin(k, fan_in, fan_out):
        kw, kb = jax.random.split(k)
        w = 0.4 * jax.random.normal(kw, (fan_in, fan_out), jnp.float32)
        b = 0.1 * jax.random.normal(kb, (1, fan_out), jnp.float32)
        return w, b

    def bn(k):
        kg, kb = jax.random.split(k)
        g = 1.0 + 0.1 * jax.random.normal(kg, (1, emb_dim), jnp.float32)
        b = 0.1 * jax.random.normal(kb, (1, emb_dim), jnp.float32)
        return g, b

    w_in, b_in = lin(ks[0], in_dim, emb_dim)

    # mlp_msg applied order: Lin_a, BN_x, tanh, Lin_b, BN_x, tanh, Lin_b, BN_y,
    # tanh, Lin_c(emb -> 2emb)   (list-multiplication shares Lin_b and BN_x)
    wa, ba = lin(ks[1], emb_dim, emb_dim)
    wb, bb = lin(ks[2], emb_dim, emb_dim)
    msg_wout, msg_bout = lin(ks[3], emb_dim, 2 * emb_dim)
    gx, bx = bn(ks[4])
    gy, by = bn(ks[5])
    msg_w = jnp.stack([wa, wb, wb])
    msg_b = jnp.stack([ba, bb, bb])
    msg_g = jnp.stack([gx, gx, gy])
    msg_be = jnp.stack([bx, bx, by])

    # mlp_upd applied order: (Lin, BN, tanh) x4 with Lin_b'/BN_x' shared mid-way
    wa2, ba2 = lin(ks[6], emb_dim, emb_dim)
    wb2, bb2 = lin(ks[7], emb_dim, emb_dim)
    wc2, bc2 = lin(ks[8], emb_dim, emb_dim)
    gx2, bx2 = bn(ks[9])
    gy2, by2 = bn(ks[10])
    gz2, bz2 = bn(ks[11])
    upd_w = jnp.stack([wa2, wb2, wb2, wc2])
    upd_b = jnp.stack([ba2, bb2, bb2, bc2])
    upd_g = jnp.stack([gx2, gx2, gy2, gz2])
    upd_be = jnp.stack([bx2, bx2, by2, bz2])

    w_pred, b_pred = lin(ks[12], emb_dim, out_dim)

    return dict(w_in=w_in, b_in=b_in,
                msg_w=msg_w, msg_b=msg_b, msg_wout=msg_wout, msg_bout=msg_bout,
                msg_g=msg_g, msg_be=msg_be,
                upd_w=upd_w, upd_b=upd_b, upd_g=upd_g, upd_be=upd_be,
                w_pred=w_pred, b_pred=b_pred)


# ----------------------------------------------------------------------------
# Pure-JAX reference mirroring the PyTorch forward (single graph, full biases)
# ----------------------------------------------------------------------------
def reference_forward(pos, vel, edge_index, params):
    emb_dim = params["w_in"].shape[1]
    n = pos.shape[0]
    h = jnp.concatenate([pos, vel], -1) @ params["w_in"] + params["b_in"]
    src, dst = edge_index[0], edge_index[1]
    x = h[dst] - h[src]
    for k in range(3):
        x = x @ params["msg_w"][k] + params["msg_b"][k]
        x = _batchnorm_train_ref(x, params["msg_g"][k], params["msg_be"][k])
        x = jnp.tanh(x)
    msg = x @ params["msg_wout"] + params["msg_bout"]
    add_out = jax.ops.segment_sum(msg[:, :emb_dim], dst, num_segments=n)
    sum_mean = jax.ops.segment_sum(msg[:, emb_dim:], dst, num_segments=n)
    count = jax.ops.segment_sum(jnp.ones((dst.shape[0],), jnp.float32), dst,
                                num_segments=n)[:, None]
    y = add_out + sum_mean / jnp.maximum(count, 1.0)
    for k in range(4):
        y = y @ params["upd_w"][k] + params["upd_b"][k]
        y = _batchnorm_train_ref(y, params["upd_g"][k], params["upd_be"][k])
        y = jnp.tanh(y)
    return y @ params["w_pred"] + params["b_pred"]


if __name__ == "__main__":
    key = jax.random.PRNGKey(0)
    k_par, k_pos, k_vel = jax.random.split(key, 3)

    B = 32                # graphs packed on lanes: B * emb_dim == 128 lanes
    N = 8                 # nodes per graph
    emb_dim, out_dim = 4, 2

    pos = jax.random.normal(k_pos, (B, N, 2), jnp.float32)
    vel = jax.random.normal(k_vel, (B, N, 2), jnp.float32)

    # bidirectional ring + skip-2 neighbours -> every node is a message target
    idx = jnp.arange(N, dtype=jnp.int32)
    src = jnp.concatenate([idx, idx, idx, idx])
    dst = jnp.concatenate([(idx + 1) % N, (idx - 1) % N,
                           (idx + 2) % N, (idx - 2) % N])
    edge_index = jnp.stack([src, dst]).astype(jnp.int32)   # [2, 32]

    params = init_params(k_par, emb_dim=emb_dim, out_dim=out_dim)

    out = flocking_forward(pos, vel, edge_index, params)
    out = jax.block_until_ready(out)

    ref = jax.vmap(lambda p, v: reference_forward(p, v, edge_index, params))(pos, vel)
    assert out.shape == (B, N, out_dim)
    # Relaxed tolerance: the kernel computes BN variance as E[x^2]-mu^2 on the
    # MXU and drops the exactly-cancelled pre-BN / lin_in biases -> few-ULP
    # floating-point differences vs. the two-pass reference.
    assert jnp.allclose(out, ref, rtol=2e-3, atol=5e-4), (out, ref)

    print("KERNEL_OK")
</pallas_src>

<mosaic_0001>
module attributes {stable_mosaic.version = 11 : i64} {
  func.func @_flocking_kernel(%arg0: memref<8x128xf32, #tpu.memory_space<vmem>>, %arg1: memref<32x8xf32, #tpu.memory_space<vmem>>, %arg2: memref<8x32xf32, #tpu.memory_space<vmem>>, %arg3: memref<8x1xf32, #tpu.memory_space<vmem>>, %arg4: memref<128x128xf32, #tpu.memory_space<vmem>>, %arg5: memref<3x128x128xf32, #tpu.memory_space<vmem>>, %arg6: memref<3x1x128xf32, #tpu.memory_space<vmem>>, %arg7: memref<3x1x128xf32, #tpu.memory_space<vmem>>, %arg8: memref<128x256xf32, #tpu.memory_space<vmem>>, %arg9: memref<1x256xf32, #tpu.memory_space<vmem>>, %arg10: memref<4x128x128xf32, #tpu.memory_space<vmem>>, %arg11: memref<4x1x128xf32, #tpu.memory_space<vmem>>, %arg12: memref<4x1x128xf32, #tpu.memory_space<vmem>>, %arg13: memref<128x64xf32, #tpu.memory_space<vmem>>, %arg14: memref<1x64xf32, #tpu.memory_space<vmem>>, %arg15: memref<8x64xf32, #tpu.memory_space<vmem>>) attributes {dimension_semantics = [], scalar_prefetch = 0 : i64, scratch_operands = 0 : i64, tpu.core_type = #tpu.core_type<tc>} {
    %cst = arith.constant 3.125000e-02 : f32
    %0 = vector.broadcast %cst : f32 to vector<1x32xf32>
    %cst_0 = arith.constant 1.250000e-01 : f32
    %1 = vector.broadcast %cst_0 : f32 to vector<1x8xf32>
    %c0 = arith.constant 0 : index
    %c0_1 = arith.constant 0 : index
    %2 = vector.load %arg0[%c0, %c0_1] : memref<8x128xf32, #tpu.memory_space<vmem>>, vector<8x128xf32>
    %c0_2 = arith.constant 0 : index
    %c0_3 = arith.constant 0 : index
    %3 = vector.load %arg4[%c0_2, %c0_3] : memref<128x128xf32, #tpu.memory_space<vmem>>, vector<128x128xf32>
    %cst_4 = arith.constant dense<0.000000e+00> : vector<8x128xf32>
    %4 = tpu.matmul %2, %3, %cst_4 {dimension_numbers = #tpu.dot_dimension_numbers<[1], [0], [0], [1], [0, 0, 1, 1], [], []>} : vector<8x128xf32>, vector<128x128xf32>, vector<8x128xf32> -> vector<8x128xf32>
    %c0_5 = arith.constant 0 : index
    %c0_6 = arith.constant 0 : index
    %5 = vector.load %arg1[%c0_5, %c0_6] : memref<32x8xf32, #tpu.memory_space<vmem>>, vector<32x8xf32>
    %cst_7 = arith.constant dense<0.000000e+00> : vector<32x128xf32>
    %6 = tpu.matmul %5, %4, %cst_7 {dimension_numbers = #tpu.dot_dimension_numbers<[1], [0], [0], [1], [0, 0, 1, 1], [], []>} : vector<32x8xf32>, vector<8x128xf32>, vector<32x128xf32> -> vector<32x128xf32>
    %c0_8 = arith.constant 0 : index
    %c0_9 = arith.constant 0 : index
    %c0_10 = arith.constant 0 : index
    %7 = vector.load %arg5[%c0_8, %c0_9, %c0_10] : memref<3x128x128xf32, #tpu.memory_space<vmem>>, vector<1x128x128xf32>
    %8 = vector.shape_cast %7 : vector<1x128x128xf32> to vector<128x128xf32>
    %cst_11 = arith.constant dense<0.000000e+00> : vector<32x128xf32>
    %9 = tpu.matmul %6, %8, %cst_11 {dimension_numbers = #tpu.dot_dimension_numbers<[1], [0], [0], [1], [0, 0, 1, 1], [], []>} : vector<32x128xf32>, vector<128x128xf32>, vector<32x128xf32> -> vector<32x128xf32>
    %c0_12 = arith.constant 0 : index
    %c0_13 = arith.constant 0 : index
    %c0_14 = arith.constant 0 : index
    %10 = vector.load %arg6[%c0_12, %c0_13, %c0_14] : memref<3x1x128xf32, #tpu.memory_space<vmem>>, vector<1x1x128xf32>
    %11 = vector.shape_cast %10 : vector<1x1x128xf32> to vector<1x128xf32>
    %c0_15 = arith.constant 0 : index
    %c0_16 = arith.constant 0 : index
    %c0_17 = arith.constant 0 : index
    %12 = vector.load %arg7[%c0_15, %c0_16, %c0_17] : memref<3x1x128xf32, #tpu.memory_space<vmem>>, vector<1x1x128xf32>
    %13 = vector.shape_cast %12 : vector<1x1x128xf32> to vector<1x128xf32>
    %14 = arith.mulf %9, %9 : vector<32x128xf32>
    %15 = tpu.concatenate %9, %14 in 1 : vector<32x128xf32>, vector<32x128xf32> -> vector<32x256xf32>
    %cst_18 = arith.constant dense<0.000000e+00> : vector<1x256xf32>
    %16 = tpu.matmul %0, %15, %cst_18 {dimension_numbers = #tpu.dot_dimension_numbers<[1], [0], [0], [1], [0, 0, 1, 1], [], []>} : vector<1x32xf32>, vector<32x256xf32>, vector<1x256xf32> -> vector<1x256xf32>
    %17 = vector.extract_strided_slice %16 {offsets = [0, 0], sizes = [1, 128], strides = [1, 1]} : vector<1x256xf32> to vector<1x128xf32>
    %18 = vector.extract_strided_slice %16 {offsets = [0, 128], sizes = [1, 128], strides = [1, 1]} : vector<1x256xf32> to vector<1x128xf32>
    %19 = arith.mulf %17, %17 : vector<1x128xf32>
    %20 = arith.subf %18, %19 : vector<1x128xf32>
    %cst_19 = arith.constant 0.000000e+00 : f32
    %21 = vector.broadcast %cst_19 : f32 to vector<1x128xf32>
    %22 = arith.maximumf %20, %21 : vector<1x128xf32>
    %23 = vector.broadcast %17 : vector<1x128xf32> to vector<32x128xf32>
    %24 = arith.subf %9, %23 : vector<32x128xf32>
    %cst_20 = arith.constant 9.99999974E-6 : f32
    %25 = vector.broadcast %cst_20 : f32 to vector<1x128xf32>
    %26 = arith.addf %22, %25 : vector<1x128xf32>
    %27 = math.rsqrt %26 : vector<1x128xf32>
    %28 = vector.broadcast %27 : vector<1x128xf32> to vector<32x128xf32>
    %29 = arith.mulf %24, %28 : vector<32x128xf32>
    %30 = vector.broadcast %11 : vector<1x128xf32> to vector<32x128xf32>
    %31 = arith.mulf %29, %30 : vector<32x128xf32>
    %32 = vector.broadcast %13 : vector<1x128xf32> to vector<32x128xf32>
    %33 = arith.addf %31, %32 : vector<32x128xf32>
    %34 = math.tanh %33 : vector<32x128xf32>
    %c1 = arith.constant 1 : index
    %c0_21 = arith.constant 0 : index
    %c0_22 = arith.constant 0 : index
    %35 = vector.load %arg5[%c1, %c0_21, %c0_22] : memref<3x128x128xf32, #tpu.memory_space<vmem>>, vector<1x128x128xf32>
    %36 = vector.shape_cast %35 : vector<1x128x128xf32> to vector<128x128xf32>
    %cst_23 = arith.constant dense<0.000000e+00> : vector<32x128xf32>
    %37 = tpu.matmul %34, %36, %cst_23 {dimension_numbers = #tpu.dot_dimension_numbers<[1], [0], [0], [1], [0, 0, 1, 1], [], []>} : vector<32x128xf32>, vector<128x128xf32>, vector<32x128xf32> -> vector<32x128xf32>
    %c1_24 = arith.constant 1 : index
    %c0_25 = arith.constant 0 : index
    %c0_26 = arith.constant 0 : index
    %38 = vector.load %arg6[%c1_24, %c0_25, %c0_26] : memref<3x1x128xf32, #tpu.memory_space<vmem>>, vector<1x1x128xf32>
    %39 = vector.shape_cast %38 : vector<1x1x128xf32> to vector<1x128xf32>
    %c1_27 = arith.constant 1 : index
    %c0_28 = arith.constant 0 : index
    %c0_29 = arith.constant 0 : index
    %40 = vector.load %arg7[%c1_27, %c0_28, %c0_29] : memref<3x1x128xf32, #tpu.memory_space<vmem>>, vector<1x1x128xf32>
    %41 = vector.shape_cast %40 : vector<1x1x128xf32> to vector<1x128xf32>
    %42 = arith.mulf %37, %37 : vector<32x128xf32>
    %43 = tpu.concatenate %37, %42 in 1 : vector<32x128xf32>, vector<32x128xf32> -> vector<32x256xf32>
    %cst_30 = arith.constant dense<0.000000e+00> : vector<1x256xf32>
    %44 = tpu.matmul %0, %43, %cst_30 {dimension_numbers = #tpu.dot_dimension_numbers<[1], [0], [0], [1], [0, 0, 1, 1], [], []>} : vector<1x32xf32>, vector<32x256xf32>, vector<1x256xf32> -> vector<1x256xf32>
    %45 = vector.extract_strided_slice %44 {offsets = [0, 0], sizes = [1, 128], strides = [1, 1]} : vector<1x256xf32> to vector<1x128xf32>
    %46 = vector.extract_strided_slice %44 {offsets = [0, 128], sizes = [1, 128], strides = [1, 1]} : vector<1x256xf32> to vector<1x128xf32>
    %47 = arith.mulf %45, %45 : vector<1x128xf32>
    %48 = arith.subf %46, %47 : vector<1x128xf32>
    %cst_31 = arith.constant 0.000000e+00 : f32
    %49 = vector.broadcast %cst_31 : f32 to vector<1x128xf32>
    %50 = arith.maximumf %48, %49 : vector<1x128xf32>
    %51 = vector.broadcast %45 : vector<1x128xf32> to vector<32x128xf32>
    %52 = arith.subf %37, %51 : vector<32x128xf32>
    %cst_32 = arith.constant 9.99999974E-6 : f32
    %53 = vector.broadcast %cst_32 : f32 to vector<1x128xf32>
    %54 = arith.addf %50, %53 : vector<1x128xf32>
    %55 = math.rsqrt %54 : vector<1x128xf32>
    %56 = vector.broadcast %55 : vector<1x128xf32> to vector<32x128xf32>
    %57 = arith.mulf %52, %56 : vector<32x128xf32>
    %58 = vector.broadcast %39 : vector<1x128xf32> to vector<32x128xf32>
    %59 = arith.mulf %57, %58 : vector<32x128xf32>
    %60 = vector.broadcast %41 : vector<1x128xf32> to vector<32x128xf32>
    %61 = arith.addf %59, %60 : vector<32x128xf32>
    %62 = math.tanh %61 : vector<32x128xf32>
    %c2 = arith.constant 2 : index
    %c0_33 = arith.constant 0 : index
    %c0_34 = arith.constant 0 : index
    %63 = vector.load %arg5[%c2, %c0_33, %c0_34] : memref<3x128x128xf32, #tpu.memory_space<vmem>>, vector<1x128x128xf32>
    %64 = vector.shape_cast %63 : vector<1x128x128xf32> to vector<128x128xf32>
    %cst_35 = arith.constant dense<0.000000e+00> : vector<32x128xf32>
    %65 = tpu.matmul %62, %64, %cst_35 {dimension_numbers = #tpu.dot_dimension_numbers<[1], [0], [0], [1], [0, 0, 1, 1], [], []>} : vector<32x128xf32>, vector<128x128xf32>, vector<32x128xf32> -> vector<32x128xf32>
    %c2_36 = arith.constant 2 : index
    %c0_37 = arith.constant 0 : index
    %c0_38 = arith.constant 0 : index
    %66 = vector.load %arg6[%c2_36, %c0_37, %c0_38] : memref<3x1x128xf32, #tpu.memory_space<vmem>>, vector<1x1x128xf32>
    %67 = vector.shape_cast %66 : vector<1x1x128xf32> to vector<1x128xf32>
    %c2_39 = arith.constant 2 : index
    %c0_40 = arith.constant 0 : index
    %c0_41 = arith.constant 0 : index
    %68 = vector.load %arg7[%c2_39, %c0_40, %c0_41] : memref<3x1x128xf32, #tpu.memory_space<vmem>>, vector<1x1x128xf32>
    %69 = vector.shape_cast %68 : vector<1x1x128xf32> to vector<1x128xf32>
    %70 = arith.mulf %65, %65 : vector<32x128xf32>
    %71 = tpu.concatenate %65, %70 in 1 : vector<32x128xf32>, vector<32x128xf32> -> vector<32x256xf32>
    %cst_42 = arith.constant dense<0.000000e+00> : vector<1x256xf32>
    %72 = tpu.matmul %0, %71, %cst_42 {dimension_numbers = #tpu.dot_dimension_numbers<[1], [0], [0], [1], [0, 0, 1, 1], [], []>} : vector<1x32xf32>, vector<32x256xf32>, vector<1x256xf32> -> vector<1x256xf32>
    %73 = vector.extract_strided_slice %72 {offsets = [0, 0], sizes = [1, 128], strides = [1, 1]} : vector<1x256xf32> to vector<1x128xf32>
    %74 = vector.extract_strided_slice %72 {offsets = [0, 128], sizes = [1, 128], strides = [1, 1]} : vector<1x256xf32> to vector<1x128xf32>
    %75 = arith.mulf %73, %73 : vector<1x128xf32>
    %76 = arith.subf %74, %75 : vector<1x128xf32>
    %cst_43 = arith.constant 0.000000e+00 : f32
    %77 = vector.broadcast %cst_43 : f32 to vector<1x128xf32>
    %78 = arith.maximumf %76, %77 : vector<1x128xf32>
    %79 = vector.broadcast %73 : vector<1x128xf32> to vector<32x128xf32>
    %80 = arith.subf %65, %79 : vector<32x128xf32>
    %cst_44 = arith.constant 9.99999974E-6 : f32
    %81 = vector.broadcast %cst_44 : f32 to vector<1x128xf32>
    %82 = arith.addf %78, %81 : vector<1x128xf32>
    %83 = math.rsqrt %82 : vector<1x128xf32>
    %84 = vector.broadcast %83 : vector<1x128xf32> to vector<32x128xf32>
    %85 = arith.mulf %80, %84 : vector<32x128xf32>
    %86 = vector.broadcast %67 : vector<1x128xf32> to vector<32x128xf32>
    %87 = arith.mulf %85, %86 : vector<32x128xf32>
    %88 = vector.broadcast %69 : vector<1x128xf32> to vector<32x128xf32>
    %89 = arith.addf %87, %88 : vector<32x128xf32>
    %90 = math.tanh %89 : vector<32x128xf32>
    %c0_45 = arith.constant 0 : index
    %c0_46 = arith.constant 0 : index
    %91 = vector.load %arg8[%c0_45, %c0_46] : memref<128x256xf32, #tpu.memory_space<vmem>>, vector<128x256xf32>
    %cst_47 = arith.constant dense<0.000000e+00> : vector<32x256xf32>
    %92 = tpu.matmul %90, %91, %cst_47 {dimension_numbers = #tpu.dot_dimension_numbers<[1], [0], [0], [1], [0, 0, 1, 1], [], []>} : vector<32x128xf32>, vector<128x256xf32>, vector<32x256xf32> -> vector<32x256xf32>
    %c0_48 = arith.constant 0 : index
    %c0_49 = arith.constant 0 : index
    %93 = vector.load %arg9[%c0_48, %c0_49] : memref<1x256xf32, #tpu.memory_space<vmem>>, vector<1x256xf32>
    %94 = vector.broadcast %93 : vector<1x256xf32> to vector<32x256xf32>
    %95 = arith.addf %92, %94 : vector<32x256xf32>
    %c0_50 = arith.constant 0 : index
    %c0_51 = arith.constant 0 : index
    %96 = vector.load %arg2[%c0_50, %c0_51] : memref<8x32xf32, #tpu.memory_space<vmem>>, vector<8x32xf32>
    %cst_52 = arith.constant dense<0.000000e+00> : vector<8x256xf32>
    %97 = tpu.matmul %96, %95, %cst_52 {dimension_numbers = #tpu.dot_dimension_numbers<[1], [0], [0], [1], [0, 0, 1, 1], [], []>} : vector<8x32xf32>, vector<32x256xf32>, vector<8x256xf32> -> vector<8x256xf32>
    %98 = vector.extract_strided_slice %97 {offsets = [0, 0], sizes = [8, 128], strides = [1, 1]} : vector<8x256xf32> to vector<8x128xf32>
    %99 = vector.extract_strided_slice %97 {offsets = [0, 128], sizes = [8, 128], strides = [1, 1]} : vector<8x256xf32> to vector<8x128xf32>
    %c0_53 = arith.constant 0 : index
    %c0_54 = arith.constant 0 : index
    %100 = vector.load %arg3[%c0_53, %c0_54] : memref<8x1xf32, #tpu.memory_space<vmem>>, vector<8x1xf32>
    %101 = vector.broadcast %100 : vector<8x1xf32> to vector<8x128xf32>
    %102 = arith.mulf %99, %101 : vector<8x128xf32>
    %103 = arith.addf %98, %102 : vector<8x128xf32>
    %c0_55 = arith.constant 0 : index
    %c0_56 = arith.constant 0 : index
    %c0_57 = arith.constant 0 : index
    %104 = vector.load %arg10[%c0_55, %c0_56, %c0_57] : memref<4x128x128xf32, #tpu.memory_space<vmem>>, vector<1x128x128xf32>
    %105 = vector.shape_cast %104 : vector<1x128x128xf32> to vector<128x128xf32>
    %cst_58 = arith.constant dense<0.000000e+00> : vector<8x128xf32>
    %106 = tpu.matmul %103, %105, %cst_58 {dimension_numbers = #tpu.dot_dimension_numbers<[1], [0], [0], [1], [0, 0, 1, 1], [], []>} : vector<8x128xf32>, vector<128x128xf32>, vector<8x128xf32> -> vector<8x128xf32>
    %c0_59 = arith.constant 0 : index
    %c0_60 = arith.constant 0 : index
    %c0_61 = arith.constant 0 : index
    %107 = vector.load %arg11[%c0_59, %c0_60, %c0_61] : memref<4x1x128xf32, #tpu.memory_space<vmem>>, vector<1x1x128xf32>
    %108 = vector.shape_cast %107 : vector<1x1x128xf32> to vector<1x128xf32>
    %c0_62 = arith.constant 0 : index
    %c0_63 = arith.constant 0 : index
    %c0_64 = arith.constant 0 : index
    %109 = vector.load %arg12[%c0_62, %c0_63, %c0_64] : memref<4x1x128xf32, #tpu.memory_space<vmem>>, vector<1x1x128xf32>
    %110 = vector.shape_cast %109 : vector<1x1x128xf32> to vector<1x128xf32>
    %111 = arith.mulf %106, %106 : vector<8x128xf32>
    %112 = tpu.concatenate %106, %111 in 1 : vector<8x128xf32>, vector<8x128xf32> -> vector<8x256xf32>
    %cst_65 = arith.constant dense<0.000000e+00> : vector<1x256xf32>
    %113 = tpu.matmul %1, %112, %cst_65 {dimension_numbers = #tpu.dot_dimension_numbers<[1], [0], [0], [1], [0, 0, 1, 1], [], []>} : vector<1x8xf32>, vector<8x256xf32>, vector<1x256xf32> -> vector<1x256xf32>
    %114 = vector.extract_strided_slice %113 {offsets = [0, 0], sizes = [1, 128], strides = [1, 1]} : vector<1x256xf32> to vector<1x128xf32>
    %115 = vector.extract_strided_slice %113 {offsets = [0, 128], sizes = [1, 128], strides = [1, 1]} : vector<1x256xf32> to vector<1x128xf32>
    %116 = arith.mulf %114, %114 : vector<1x128xf32>
    %117 = arith.subf %115, %116 : vector<1x128xf32>
    %cst_66 = arith.constant 0.000000e+00 : f32
    %118 = vector.broadcast %cst_66 : f32 to vector<1x128xf32>
    %119 = arith.maximumf %117, %118 : vector<1x128xf32>
    %120 = vector.broadcast %114 : vector<1x128xf32> to vector<8x128xf32>
    %121 = arith.subf %106, %120 : vector<8x128xf32>
    %cst_67 = arith.constant 9.99999974E-6 : f32
    %122 = vector.broadcast %cst_67 : f32 to vector<1x128xf32>
    %123 = arith.addf %119, %122 : vector<1x128xf32>
    %124 = math.rsqrt %123 : vector<1x128xf32>
    %125 = vector.broadcast %124 : vector<1x128xf32> to vector<8x128xf32>
    %126 = arith.mulf %121, %125 : vector<8x128xf32>
    %127 = vector.broadcast %108 : vector<1x128xf32> to vector<8x128xf32>
    %128 = arith.mulf %126, %127 : vector<8x128xf32>
    %129 = vector.broadcast %110 : vector<1x128xf32> to vector<8x128xf32>
    %130 = arith.addf %128, %129 : vector<8x128xf32>
    %131 = math.tanh %130 : vector<8x128xf32>
    %c1_68 = arith.constant 1 : index
    %c0_69 = arith.constant 0 : index
    %c0_70 = arith.constant 0 : index
    %132 = vector.load %arg10[%c1_68, %c0_69, %c0_70] : memref<4x128x128xf32, #tpu.memory_space<vmem>>, vector<1x128x128xf32>
    %133 = vector.shape_cast %132 : vector<1x128x128xf32> to vector<128x128xf32>
    %cst_71 = arith.constant dense<0.000000e+00> : vector<8x128xf32>
    %134 = tpu.matmul %131, %133, %cst_71 {dimension_numbers = #tpu.dot_dimension_numbers<[1], [0], [0], [1], [0, 0, 1, 1], [], []>} : vector<8x128xf32>, vector<128x128xf32>, vector<8x128xf32> -> vector<8x128xf32>
    %c1_72 = arith.constant 1 : index
    %c0_73 = arith.constant 0 : index
    %c0_74 = arith.constant 0 : index
    %135 = vector.load %arg11[%c1_72, %c0_73, %c0_74] : memref<4x1x128xf32, #tpu.memory_space<vmem>>, vector<1x1x128xf32>
    %136 = vector.shape_cast %135 : vector<1x1x128xf32> to vector<1x128xf32>
    %c1_75 = arith.constant 1 : index
    %c0_76 = arith.constant 0 : index
    %c0_77 = arith.constant 0 : index
    %137 = vector.load %arg12[%c1_75, %c0_76, %c0_77] : memref<4x1x128xf32, #tpu.memory_space<vmem>>, vector<1x1x128xf32>
    %138 = vector.shape_cast %137 : vector<1x1x128xf32> to vector<1x128xf32>
    %139 = arith.mulf %134, %134 : vector<8x128xf32>
    %140 = tpu.concatenate %134, %139 in 1 : vector<8x128xf32>, vector<8x128xf32> -> vector<8x256xf32>
    %cst_78 = arith.constant dense<0.000000e+00> : vector<1x256xf32>
    %141 = tpu.matmul %1, %140, %cst_78 {dimension_numbers = #tpu.dot_dimension_numbers<[1], [0], [0], [1], [0, 0, 1, 1], [], []>} : vector<1x8xf32>, vector<8x256xf32>, vector<1x256xf32> -> vector<1x256xf32>
    %142 = vector.extract_strided_slice %141 {offsets = [0, 0], sizes = [1, 128], strides = [1, 1]} : vector<1x256xf32> to vector<1x128xf32>
    %143 = vector.extract_strided_slice %141 {offsets = [0, 128], sizes = [1, 128], strides = [1, 1]} : vector<1x256xf32> to vector<1x128xf32>
    %144 = arith.mulf %142, %142 : vector<1x128xf32>
    %145 = arith.subf %143, %144 : vector<1x128xf32>
    %cst_79 = arith.constant 0.000000e+00 : f32
    %146 = vector.broadcast %cst_79 : f32 to vector<1x128xf32>
    %147 = arith.maximumf %145, %146 : vector<1x128xf32>
    %148 = vector.broadcast %142 : vector<1x128xf32> to vector<8x128xf32>
    %149 = arith.subf %134, %148 : vector<8x128xf32>
    %cst_80 = arith.constant 9.99999974E-6 : f32
    %150 = vector.broadcast %cst_80 : f32 to vector<1x128xf32>
    %151 = arith.addf %147, %150 : vector<1x128xf32>
    %152 = math.rsqrt %151 : vector<1x128xf32>
    %153 = vector.broadcast %152 : vector<1x128xf32> to vector<8x128xf32>
    %154 = arith.mulf %149, %153 : vector<8x128xf32>
    %155 = vector.broadcast %136 : vector<1x128xf32> to vector<8x128xf32>
    %156 = arith.mulf %154, %155 : vector<8x128xf32>
    %157 = vector.broadcast %138 : vector<1x128xf32> to vector<8x128xf32>
    %158 = arith.addf %156, %157 : vector<8x128xf32>
    %159 = math.tanh %158 : vector<8x128xf32>
    %c2_81 = arith.constant 2 : index
    %c0_82 = arith.constant 0 : index
    %c0_83 = arith.constant 0 : index
    %160 = vector.load %arg10[%c2_81, %c0_82, %c0_83] : memref<4x128x128xf32, #tpu.memory_space<vmem>>, vector<1x128x128xf32>
    %161 = vector.shape_cast %160 : vector<1x128x128xf32> to vector<128x128xf32>
    %cst_84 = arith.constant dense<0.000000e+00> : vector<8x128xf32>
    %162 = tpu.matmul %159, %161, %cst_84 {dimension_numbers = #tpu.dot_dimension_numbers<[1], [0], [0], [1], [0, 0, 1, 1], [], []>} : vector<8x128xf32>, vector<128x128xf32>, vector<8x128xf32> -> vector<8x128xf32>
    %c2_85 = arith.constant 2 : index
    %c0_86 = arith.constant 0 : index
    %c0_87 = arith.constant 0 : index
    %163 = vector.load %arg11[%c2_85, %c0_86, %c0_87] : memref<4x1x128xf32, #tpu.memory_space<vmem>>, vector<1x1x128xf32>
    %164 = vector.shape_cast %163 : vector<1x1x128xf32> to vector<1x128xf32>
    %c2_88 = arith.constant 2 : index
    %c0_89 = arith.constant 0 : index
    %c0_90 = arith.constant 0 : index
    %165 = vector.load %arg12[%c2_88, %c0_89, %c0_90] : memref<4x1x128xf32, #tpu.memory_space<vmem>>, vector<1x1x128xf32>
    %166 = vector.shape_cast %165 : vector<1x1x128xf32> to vector<1x128xf32>
    %167 = arith.mulf %162, %162 : vector<8x128xf32>
    %168 = tpu.concatenate %162, %167 in 1 : vector<8x128xf32>, vector<8x128xf32> -> vector<8x256xf32>
    %cst_91 = arith.constant dense<0.000000e+00> : vector<1x256xf32>
    %169 = tpu.matmul %1, %168, %cst_91 {dimension_numbers = #tpu.dot_dimension_numbers<[1], [0], [0], [1], [0, 0, 1, 1], [], []>} : vector<1x8xf32>, vector<8x256xf32>, vector<1x256xf32> -> vector<1x256xf32>
    %170 = vector.extract_strided_slice %169 {offsets = [0, 0], sizes = [1, 128], strides = [1, 1]} : vector<1x256xf32> to vector<1x128xf32>
    %171 = vector.extract_strided_slice %169 {offsets = [0, 128], sizes = [1, 128], strides = [1, 1]} : vector<1x256xf32> to vector<1x128xf32>
    %172 = arith.mulf %170, %170 : vector<1x128xf32>
    %173 = arith.subf %171, %172 : vector<1x128xf32>
    %cst_92 = arith.constant 0.000000e+00 : f32
    %174 = vector.broadcast %cst_92 : f32 to vector<1x128xf32>
    %175 = arith.maximumf %173, %174 : vector<1x128xf32>
    %176 = vector.broadcast %170 : vector<1x128xf32> to vector<8x128xf32>
    %177 = arith.subf %162, %176 : vector<8x128xf32>
    %cst_93 = arith.constant 9.99999974E-6 : f32
    %178 = vector.broadcast %cst_93 : f32 to vector<1x128xf32>
    %179 = arith.addf %175, %178 : vector<1x128xf32>
    %180 = math.rsqrt %179 : vector<1x128xf32>
    %181 = vector.broadcast %180 : vector<1x128xf32> to vector<8x128xf32>
    %182 = arith.mulf %177, %181 : vector<8x128xf32>
    %183 = vector.broadcast %164 : vector<1x128xf32> to vector<8x128xf32>
    %184 = arith.mulf %182, %183 : vector<8x128xf32>
    %185 = vector.broadcast %166 : vector<1x128xf32> to vector<8x128xf32>
    %186 = arith.addf %184, %185 : vector<8x128xf32>
    %187 = math.tanh %186 : vector<8x128xf32>
    %c3 = arith.constant 3 : index
    %c0_94 = arith.constant 0 : index
    %c0_95 = arith.constant 0 : index
    %188 = vector.load %arg10[%c3, %c0_94, %c0_95] : memref<4x128x128xf32, #tpu.memory_space<vmem>>, vector<1x128x128xf32>
    %189 = vector.shape_cast %188 : vector<1x128x128xf32> to vector<128x128xf32>
    %cst_96 = arith.constant dense<0.000000e+00> : vector<8x128xf32>
    %190 = tpu.matmul %187, %189, %cst_96 {dimension_numbers = #tpu.dot_dimension_numbers<[1], [0], [0], [1], [0, 0, 1, 1], [], []>} : vector<8x128xf32>, vector<128x128xf32>, vector<8x128xf32> -> vector<8x128xf32>
    %c3_97 = arith.constant 3 : index
    %c0_98 = arith.constant 0 : index
    %c0_99 = arith.constant 0 : index
    %191 = vector.load %arg11[%c3_97, %c0_98, %c0_99] : memref<4x1x128xf32, #tpu.memory_space<vmem>>, vector<1x1x128xf32>
    %192 = vector.shape_cast %191 : vector<1x1x128xf32> to vector<1x128xf32>
    %c3_100 = arith.constant 3 : index
    %c0_101 = arith.constant 0 : index
    %c0_102 = arith.constant 0 : index
    %193 = vector.load %arg12[%c3_100, %c0_101, %c0_102] : memref<4x1x128xf32, #tpu.memory_space<vmem>>, vector<1x1x128xf32>
    %194 = vector.shape_cast %193 : vector<1x1x128xf32> to vector<1x128xf32>
    %195 = arith.mulf %190, %190 : vector<8x128xf32>
    %196 = tpu.concatenate %190, %195 in 1 : vector<8x128xf32>, vector<8x128xf32> -> vector<8x256xf32>
    %cst_103 = arith.constant dense<0.000000e+00> : vector<1x256xf32>
    %197 = tpu.matmul %1, %196, %cst_103 {dimension_numbers = #tpu.dot_dimension_numbers<[1], [0], [0], [1], [0, 0, 1, 1], [], []>} : vector<1x8xf32>, vector<8x256xf32>, vector<1x256xf32> -> vector<1x256xf32>
    %198 = vector.extract_strided_slice %197 {offsets = [0, 0], sizes = [1, 128], strides = [1, 1]} : vector<1x256xf32> to vector<1x128xf32>
    %199 = vector.extract_strided_slice %197 {offsets = [0, 128], sizes = [1, 128], strides = [1, 1]} : vector<1x256xf32> to vector<1x128xf32>
    %200 = arith.mulf %198, %198 : vector<1x128xf32>
    %201 = arith.subf %199, %200 : vector<1x128xf32>
    %cst_104 = arith.constant 0.000000e+00 : f32
    %202 = vector.broadcast %cst_104 : f32 to vector<1x128xf32>
    %203 = arith.maximumf %201, %202 : vector<1x128xf32>
    %204 = vector.broadcast %198 : vector<1x128xf32> to vector<8x128xf32>
    %205 = arith.subf %190, %204 : vector<8x128xf32>
    %cst_105 = arith.constant 9.99999974E-6 : f32
    %206 = vector.broadcast %cst_105 : f32 to vector<1x128xf32>
    %207 = arith.addf %203, %206 : vector<1x128xf32>
    %208 = math.rsqrt %207 : vector<1x128xf32>
    %209 = vector.broadcast %208 : vector<1x128xf32> to vector<8x128xf32>
    %210 = arith.mulf %205, %209 : vector<8x128xf32>
    %211 = vector.broadcast %192 : vector<1x128xf32> to vector<8x128xf32>
    %212 = arith.mulf %210, %211 : vector<8x128xf32>
    %213 = vector.broadcast %194 : vector<1x128xf32> to vector<8x128xf32>
    %214 = arith.addf %212, %213 : vector<8x128xf32>
    %215 = math.tanh %214 : vector<8x128xf32>
    %c0_106 = arith.constant 0 : index
    %c0_107 = arith.constant 0 : index
    %216 = vector.load %arg13[%c0_106, %c0_107] : memref<128x64xf32, #tpu.memory_space<vmem>>, vector<128x64xf32>
    %cst_108 = arith.constant dense<0.000000e+00> : vector<8x64xf32>
    %217 = tpu.matmul %215, %216, %cst_108 {dimension_numbers = #tpu.dot_dimension_numbers<[1], [0], [0], [1], [0, 0, 1, 1], [], []>} : vector<8x128xf32>, vector<128x64xf32>, vector<8x64xf32> -> vector<8x64xf32>
    %c0_109 = arith.constant 0 : index
    %c0_110 = arith.constant 0 : index
    %218 = vector.load %arg14[%c0_109, %c0_110] : memref<1x64xf32, #tpu.memory_space<vmem>>, vector<1x64xf32>
    %219 = vector.broadcast %218 : vector<1x64xf32> to vector<8x64xf32>
    %220 = arith.addf %217, %219 : vector<8x64xf32>
    %c0_111 = arith.constant 0 : index
    %c0_112 = arith.constant 0 : index
    %221 = vector.load %arg15[%c0_111, %c0_112] : memref<8x64xf32, #tpu.memory_space<vmem>>, vector<8x64xf32>
    tpu.vector_store %arg15[%c0_111, %c0_112], %220 {strides = array<i32>} : memref<8x64xf32, #tpu.memory_space<vmem>>, vector<8x64xf32>,
    return
  }
}

</mosaic_0001>

<bundles_post_ra>
// kernel: tpu_custom_call.1
= control target key start
LH: loop header
LB: loop body
LE: loop exit
PB: predicated region body
PF: predicated region fallthrough
CT: control target
= control target key end

     0   :  { %20 = vsyncpa [#allocation3], 0  ;;  %s3750_s0 = inlined_call_operand.vmem [shape: f32[8,128], index: 0, kind: input, shape index: {}]   ;;  %s3751_s1 = inlined_call_operand.vmem [shape: f32[32,8], index: 1, kind: input, shape index: {}]   ;;  %s3752_s2 = inlined_call_operand.hbm [shape: f32[8,32], index: 2, kind: input, shape index: {}]   ;;  %s3753_s3 = inlined_call_operand.vmem [shape: f32[8,1], index: 3, kind: input, shape index: {}]   ;;  %s3754_s4 = inlined_call_operand.hbm [shape: f32[128,128], index: 4, kind: input, shape index: {}]   ;;  %s3755_s5 = inlined_call_operand.hbm [shape: f32[3,128,128], index: 5, kind: input, shape index: {}]   ;;  %s3756_s6 = inlined_call_operand.vmem [shape: f32[3,1,128], index: 6, kind: input, shape index: {}]   ;;  %s3757_s7 = inlined_call_operand.hbm [shape: f32[3,1,128], index: 7, kind: input, shape index: {}]   ;;  %s3758_s8 = inlined_call_operand.vmem [shape: f32[128,256], index: 8, kind: input, shape index: {}]   ;;  %s3759_s9 = inlined_call_operand.hbm [shape: f32[1,256], index: 9, kind: input, shape index: {}]   ;;  %s3760_s10 = inlined_call_operand.hbm [shape: f32[4,128,128], index: 10, kind: input, shape index: {}]   ;;  %s3761_s11 = inlined_call_operand.vmem [shape: f32[4,1,128], index: 11, kind: input, shape index: {}]   ;;  %s3762_s12 = inlined_call_operand.vmem [shape: f32[4,1,128], index: 12, kind: input, shape index: {}]   ;;  %s3763_s13 = inlined_call_operand.vmem [shape: f32[128,64], index: 13, kind: input, shape index: {}]   ;;  %s3764_s14 = inlined_call_operand.vmem [shape: f32[1,64], index: 14, kind: input, shape index: {}]   ;;  %s3765_s15 = inlined_call_operand.hbm [shape: f32[8,64], index: 15, kind: output, shape index: {}]  }
   0x1   :  { %21 = vsyncpa [#allocation6], 0 }
   0x2   :  { %22 = vsyncpa [#allocation9], 0 }
   0x3   :  { %23 = vsyncpa [#allocation12], 0 }
   0x4   :  { %24 = vsyncpa [#allocation4], 0  ;;  %s3164_s18 = smov [#allocation5]   ;;  %s3000_s22 = scalar_lea.hbm %s3754_s4, 2048 }
   0x5   :  { %s46_s19 = sshll.u32 %s3164_s18, 4  ;;  %p3001_p0 = scmp.ne.s32.totalorder %s3754_s4, %s3000_s22  ;;  %s47_s19 = int_to_ptr.vmem [resolvable:$true] %s46_s19 }
   0x6   :  { %p3004_p1 = scmp.lt.u32.totalorder %s3000_s22, %s3754_s4 }
   0x8   :  { %p3006_p2 = pnand %p3004_p1, %p3001_p0 }
   0xa   :  { %3009 = shalt.err (!%p3006_p2)
}
   0xb   :  { %s3010_s27 = scalar_lea.vmem %s47_s19, 2048  ;;  %p3015_p4 = scmp.lt.s32.totalorder %s47_s19, %s47_s19 }
   0xc   :  { %p3011_p3 = scmp.ne.s32.totalorder %s47_s19, %s3010_s27  ;;  %p3016_p5 = scmp.lt.s32.totalorder %s3010_s27, %s3010_s27 }
   0xe   :  { %p3017_p6 = por %p3016_p5, %p3015_p4 }
  0x10   :  { %p3018_p7 = pnand %p3017_p6, %p3011_p3 }
  0x12   :  { %3021 = shalt.err (!%p3018_p7)
}
  0x13   :  { %s3766_s28 = smov 128   ;;  %s3768_s29 = smov 8  }
  0x14   :  { %52 = dma.hbm_to_vmem [thread:$0]  %s3754_s4, 2048, %s47_s19, [#allocation6], %s3766_s28, %s3766_s28, %s3768_s29  }
  0x15   :  { %s3167_s17 = smov [#allocation8]   ;;  %s3022_s22 = scalar_lea.hbm %s3757_s7, 48 }
  0x16   :  { %s72_s18 = sshll.u32 %s3167_s17, 4  ;;  %p3023_p8 = scmp.ne.s32.totalorder %s3757_s7, %s3022_s22  ;;  %s73_s18 = int_to_ptr.vmem [resolvable:$true] %s72_s18 }
  0x17   :  { %p3026_p9 = scmp.lt.u32.totalorder %s3022_s22, %s3757_s7 }
  0x19   :  { %p3028_p10 = pnand %p3026_p9, %p3023_p8 }
  0x1b   :  { %3031 = shalt.err (!%p3028_p10)
}
  0x1c   :  { %s3032_s27 = scalar_lea.vmem %s73_s18, 48  ;;  %s3036_s4 = scalar_lea.vmem %s73_s18, 64 }
  0x1d   :  { %p3033_p11 = scmp.ne.s32.totalorder %s73_s18, %s3032_s27  ;;  %p3037_p12 = scmp.lt.s32.totalorder %s73_s18, %s73_s18 }
  0x1e   :  { %p3038_p13 = scmp.lt.s32.totalorder %s3036_s4, %s3032_s27 }
  0x20   :  { %p3039_p0 = por %p3038_p13, %p3037_p12 }
  0x22   :  { %p3040_p1 = pnand %p3039_p0, %p3033_p11 }
  0x24   :  { %3043 = shalt.err (!%p3040_p1)
}
  0x25   :  { %s3168_s19 = smov 16   ;;  %s3169_s30 = smov 1  }
  0x26   :  { %78 = dma.hbm_to_vmem [thread:$0]  %s3757_s7, 48, %s73_s18, [#allocation9], %s3168_s19, %s3168_s19, %s3169_s30  }
  0x27   :  { %s3170_s20 = smov [#allocation2]   ;;  %s3171_s23 = smov [#allocation7]  }
  0x28   :  { %s35_s21 = sshll.u32 %s3170_s20, 4  ;;  %s58_s22 = sshll.u32 %s3171_s23, 4  ;;  %s36_s21 = int_to_ptr.vmem [resolvable:$true] %s35_s21  ;;  %s3288_s22 = int_to_ptr.vmem [resolvable:$true] %s58_s22 }
  0x29   :  { %s3044_s26 = scalar_lea.hbm %s3752_s2, 128 }
  0x2a   :  { %p3045_p2 = scmp.ne.s32.totalorder %s3752_s2, %s3044_s26  ;;  %p3048_p3 = scmp.lt.u32.totalorder %s3044_s26, %s3752_s2 }
  0x2c   :  { %p3050_p4 = pnand %p3048_p3, %p3045_p2 }
  0x2e   :  { %3053 = shalt.err (!%p3050_p4)
}
  0x2f   :  { %s3054_s7 = scalar_lea.vmem %s36_s21, 128  ;;  %p3059_p6 = scmp.lt.s32.totalorder %s36_s21, %s36_s21 }
  0x30   :  { %p3055_p5 = scmp.ne.s32.totalorder %s36_s21, %s3054_s7  ;;  %p3060_p7 = scmp.lt.s32.totalorder %s3054_s7, %s3054_s7 }
  0x32   :  { %p3061_p8 = por %p3060_p7, %p3059_p6 }
  0x34   :  { %p3062_p9 = pnand %p3061_p8, %p3055_p5 }
  0x36   :  { %3065 = shalt.err (!%p3062_p9)
}
  0x37   :  { %38 = dma.hbm_to_vmem [thread:$0]  %s3752_s2, 128, %s36_s21, [#allocation3]  }
  0x38   :  { %s3066_s17 = scalar_lea.hbm %s3755_s5, 6144 }
  0x39   :  { %p3067_p10 = scmp.ne.s32.totalorder %s3755_s5, %s3066_s17  ;;  %p3070_p11 = scmp.lt.u32.totalorder %s3066_s17, %s3755_s5 }
  0x3b   :  { %p3072_p12 = pnand %p3070_p11, %p3067_p10 }
  0x3d   :  { %3075 = shalt.err (!%p3072_p12)
}
  0x3e   :  { %s3076_s24 = scalar_lea.vmem %s3288_s22, 6144  ;;  %p3081_p0 = scmp.lt.s32.totalorder %s3288_s22, %s3288_s22 }
  0x3f   :  { %p3077_p13 = scmp.ne.s32.totalorder %s3288_s22, %s3076_s24  ;;  %p3082_p1 = scmp.lt.s32.totalorder %s3076_s24, %s3076_s24 }
  0x41   :  { %p3083_p2 = por %p3082_p1, %p3081_p0 }
  0x43   :  { %p3084_p3 = pnand %p3083_p2, %p3077_p13 }
  0x45   :  { %3087 = shalt.err (!%p3084_p3)
}
  0x46   :  { %s3770_s2 = smov 8   ;;  %s3771_s21 = smov 128  }
  0x47   :  { %64 = dma.hbm_to_vmem [thread:$0]  %s3755_s5, 6144, %s3288_s22, [#allocation6], %s3771_s21, %s3771_s21, %s3770_s2  }
  0x48   :  { %s3172_s27 = smov [#allocation10]   ;;  %s3173_s7 = smov [#allocation11]  }
  0x49   :  { %s87_s4 = sshll.u32 %s3172_s27, 4  ;;  %s96_s18 = sshll.u32 %s3173_s7, 4  ;;  %s88_s4 = int_to_ptr.vmem [resolvable:$true] %s87_s4  ;;  %s3322_s18 = int_to_ptr.vmem [resolvable:$true] %s96_s18 }
  0x4a   :  { %s3088_s16 = scalar_lea.hbm %s3759_s9, 32 }
  0x4b   :  { %p3089_p4 = scmp.ne.s32.totalorder %s3759_s9, %s3088_s16  ;;  %p3092_p5 = scmp.lt.u32.totalorder %s3088_s16, %s3759_s9 }
  0x4d   :  { %p3094_p6 = pnand %p3092_p5, %p3089_p4 }
  0x4f   :  { %3097 = shalt.err (!%p3094_p6)
}
  0x50   :  { %s3098_s5 = scalar_lea.vmem %s88_s4, 32  ;;  %p3103_p8 = scmp.lt.s32.totalorder %s88_s4, %s88_s4 }
  0x51   :  { %p3099_p7 = scmp.ne.s32.totalorder %s88_s4, %s3098_s5  ;;  %p3104_p9 = scmp.lt.s32.totalorder %s3098_s5, %s3098_s5 }
  0x53   :  { %p3105_p10 = por %p3104_p9, %p3103_p8 }
  0x55   :  { %p3106_p11 = pnand %p3105_p10, %p3099_p7 }
  0x57   :  { %3109 = shalt.err (!%p3106_p11)
}
  0x58   :  { %90 = dma.hbm_to_vmem [thread:$0]  %s3759_s9, 32, %s88_s4, [#allocation9]  }
  0x59   :  { %s3110_s26 = scalar_lea.hbm %s3760_s10, 8192 }
  0x5a   :  { %p3111_p12 = scmp.ne.s32.totalorder %s3760_s10, %s3110_s26  ;;  %p3114_p13 = scmp.lt.u32.totalorder %s3110_s26, %s3760_s10 }
  0x5c   :  { %p3116_p0 = pnand %p3114_p13, %p3111_p12 }
  0x5e   :  { %3119 = shalt.err (!%p3116_p0)
}
  0x5f   :  { %s3120_s16 = scalar_lea.vmem %s3322_s18, 8192  ;;  %p3125_p2 = scmp.lt.s32.totalorder %s3322_s18, %s3322_s18 }
  0x60   :  { %p3121_p1 = scmp.ne.s32.totalorder %s3322_s18, %s3120_s16  ;;  %p3126_p3 = scmp.lt.s32.totalorder %s3120_s16, %s3120_s16 }
  0x62   :  { %p3127_p4 = por %p3126_p3, %p3125_p2 }
  0x64   :  { %p3128_p5 = pnand %p3127_p4, %p3121_p1 }
  0x66   :  { %3131 = shalt.err (!%p3128_p5)
}
  0x67   :  { %102 = dma.hbm_to_vmem [thread:$0]  %s3760_s10, 8192, %s3322_s18, [#allocation12], %s3771_s21, %s3771_s21, %s3770_s2  }
  0x68   :  { %3154 = dma.done.wait [#allocation3], 128  }
  0x69   :  { %3155 = vsyncadd [#allocation3], 4294967168 }
  0x6a   :  { %3156 = dma.done.wait [#allocation6], 8192  }
  0x6b   :  { %3157 = vsyncadd [#allocation6], 4294959104 }
  0x6c   :  { %3158 = dma.done.wait [#allocation9], 80  }
  0x6d   :  { %3159 = vsyncadd [#allocation9], 4294967216 }
  0x6e   :  { %3160 = dma.done.wait [#allocation12], 8192  }
  0x6f   :  { %3161 = vsyncadd [#allocation12], 4294959104  ;;  %v3174_v0 = vmov 0.0|0.0   ;;  %vm3175_vm0 = vmmov 0   ;;  %v3176_v1 = vmov 0.0   ;;  %v130_v2 = vld [vmem:[#allocation5] sm:$0xff] }
  0x70   :  { %2632 = vmatprep.subr.bf16.mxu0 %v3174_v0  ;;  %2332 = vmatprep.mubr.msk.f32.mxu0 %vm3175_vm0, %v3176_v1  ;;  %v131_v3 = vld [vmem:[#allocation5 + $0x8] sm:$0xff]  ;;  %v132_v4 = vld [vmem:[#allocation5 + $0x10] sm:$0xff]  ;;  %v133_v6 = vld [vmem:[#allocation5 + $0x18] sm:$0xff]  ;;  %vm220_vm1 = vcmask 64512   ;;  %vm425_vm2 = vcmask 261120   ;;  %s3180_s5 = smov [#allocation13]  }
  0x71   :  { %v2633_v5 = vpack.c.bf16 %v131_v3, %v130_v2  ;;  %v2636_v7 = vpack.c.bf16 %v133_v6, %v132_v4  ;;  %v134_v8 = vld [vmem:[#allocation5 + $0x20] sm:$0xff]  ;;  %v135_v9 = vld [vmem:[#allocation5 + $0x28] sm:$0xff]  ;;  %v136_v11 = vld [vmem:[#allocation5 + $0x30] sm:$0xff]  ;;  %vm2078_vm3 = vcmask 523264  }
  0x72   :  { %v2639_v10 = vpack.c.bf16 %v135_v9, %v134_v8  ;;  %v137_v12 = vld [vmem:[#allocation5 + $0x38] sm:$0xff]  ;;  %v138_v14 = vld [vmem:[#allocation5 + $0x40] sm:$0xff]  ;;  %v139_v15 = vld [vmem:[#allocation5 + $0x48] sm:$0xff] }
  0x73   :  { %2634 = vmatpush3.bf16.msra.mxu0 %v2633_v5  ;;  %v2642_v13 = vpack.c.bf16 %v137_v12, %v136_v11  ;;  %v2645_v16 = vpack.c.bf16 %v139_v15, %v138_v14  ;;  %v140_v17 = vld [vmem:[#allocation5 + $0x50] sm:$0xff]  ;;  %v141_v18 = vld [vmem:[#allocation5 + $0x58] sm:$0xff]  ;;  %v142_v20 = vld [vmem:[#allocation5 + $0x60] sm:$0xff]  ;;  %v3177_v11 = vmov 0.03125  }
  0x74   :  { %2635 = vmatprep.subr.bf16.mxu0 %v3174_v0  ;;  %v2648_v19 = vpack.c.bf16 %v141_v18, %v140_v17  ;;  %v143_v21 = vld [vmem:[#allocation5 + $0x68] sm:$0xff]  ;;  %v144_v23 = vld [vmem:[#allocation5 + $0x70] sm:$0xff]  ;;  %v145_v24 = vld [vmem:[#allocation5 + $0x78] sm:$0xff] }
  0x75   :  { %v2651_v22 = vpack.c.bf16 %v143_v21, %v142_v20  ;;  %v2654_v25 = vpack.c.bf16 %v145_v24, %v144_v23  ;;  %v129_v26 = vld [vmem:[%s3750_s0] sm:$0xff]  ;;  %v318_v28 = vld [vmem:[#allocation7] sm:$0xff]  ;;  %v319_v29 = vld [vmem:[#allocation7 + $0x8] sm:$0xff] }
  0x76   :  { %v216_v27 = vld [vmem:[%s3751_s1] sm:$0xff]  ;;  %v320_v30 = vld [vmem:[#allocation7 + $0x10] sm:$0xff]  ;;  %v2656_v31 = vpack.c.bf16 %v319_v29, %v318_v28  ;;  %v322_v34 = vld [vmem:[#allocation7 + $0x20] sm:$0xff] }
  0x77   :  { %2637 = vmatpush3.bf16.msra.mxu0 %v2636_v7  ;;  %v321_v32 = vld [vmem:[#allocation7 + $0x18] sm:$0xff]  ;;  %v323_v35 = vld [vmem:[#allocation7 + $0x28] sm:$0xff]  ;;  %v324_v37 = vld [vmem:[#allocation7 + $0x30] sm:$0xff] }
  0x78   :  { %2638 = vmatprep.subr.bf16.mxu0 %v3174_v0  ;;  %v2660_v33 = vpack.c.bf16 %v321_v32, %v320_v30  ;;  %2657 = vmatprep.subr.bf16.mxu1 %v2656_v31  ;;  %v2664_v36 = vpack.c.bf16 %v323_v35, %v322_v34  ;;  %v325_v38 = vld [vmem:[#allocation7 + $0x38] sm:$0xff]  ;;  %v326_v40 = vld [vmem:[#allocation7 + $0x40] sm:$0xff]  ;;  %v327_v41 = vld [vmem:[#allocation7 + $0x48] sm:$0xff] }
  0x79   :  { %2659 = vmatpush3.bf16.msra.mxu1 %v2656_v31  ;;  %v2668_v39 = vpack.c.bf16 %v325_v38, %v324_v37  ;;  %v2672_v42 = vpack.c.bf16 %v327_v41, %v326_v40  ;;  %v328_v43 = vld [vmem:[#allocation7 + $0x50] sm:$0xff]  ;;  %v329_v44 = vld [vmem:[#allocation7 + $0x58] sm:$0xff]  ;;  %v330_v46 = vld [vmem:[#allocation7 + $0x60] sm:$0xff] }
  0x7a   :  { %2661 = vmatprep.subr.bf16.mxu1 %v2660_v33  ;;  %v2676_v45 = vpack.c.bf16 %v329_v44, %v328_v43  ;;  %v331_v47 = vld [vmem:[#allocation7 + $0x68] sm:$0xff]  ;;  %v332_v49 = vld [vmem:[#allocation7 + $0x70] sm:$0xff]  ;;  %v333_v50 = vld [vmem:[#allocation7 + $0x78] sm:$0xff] }
  0x7b   :  { %2640 = vmatpush3.bf16.msra.mxu0 %v2639_v10  ;;  %v2680_v48 = vpack.c.bf16 %v331_v47, %v330_v46  ;;  %v2684_v51 = vpack.c.bf16 %v333_v50, %v332_v49  ;;  %v217_v53 = vld [vmem:[%s3751_s1 + $0x8] sm:$0xff]  ;;  %v218_v55 = vld [vmem:[%s3751_s1 + $0x10] sm:$0xff]  ;;  %v219_v56 = vld [vmem:[%s3751_s1 + $0x18] sm:$0xff] }
  0x7c   :  { %2641 = vmatprep.subr.bf16.mxu0 %v3174_v0  ;;  %v546_v12 = vld [vmem:[#allocation7 + $0x80] sm:$0xff]  ;;  %v548_v15 = vld [vmem:[#allocation7 + $0x90] sm:$0xff]  ;;  %v557_v28 = vld [vmem:[#allocation7 + $0xd8] sm:$0xff] }
  0x7d   :  { %2663 = vmatpush3.bf16.msra.mxu1 %v2660_v33  ;;  %v550_v18 = vld [vmem:[#allocation7 + $0xa0] sm:$0xff]  ;;  %v552_v21 = vld [vmem:[#allocation7 + $0xb0] sm:$0xff]  ;;  %v559_v31 = vld [vmem:[#allocation7 + $0xe8] sm:$0xff] }
  0x7e   :  { %2665 = vmatprep.subr.bf16.mxu1 %v2664_v36  ;;  %v554_v24 = vld [vmem:[#allocation7 + $0xc0] sm:$0xff]  ;;  %v560_v32 = vld [vmem:[#allocation7 + $0xf0] sm:$0xff]  ;;  %v561_v34 = vld [vmem:[#allocation7 + $0xf8] sm:$0xff] }
  0x7f   :  { %2643 = vmatpush3.bf16.msra.mxu0 %v2642_v13  ;;  %v547_v13 = vld [vmem:[#allocation7 + $0x88] sm:$0xff]  ;;  %v558_v30 = vld [vmem:[#allocation7 + $0xe0] sm:$0xff]  ;;  %v2724_v35 = vpack.c.bf16 %v561_v34, %v560_v32 }
  0x80   :  { %2644 = vmatprep.subr.bf16.mxu0 %v3174_v0  ;;  %v2696_v14 = vpack.c.bf16 %v547_v13, %v546_v12  ;;  %v2720_v33 = vpack.c.bf16 %v559_v31, %v558_v30  ;;  %v778_v30 = vld [vmem:[#allocation7 + $0x130] sm:$0xff]  ;;  %v779_v31 = vld [vmem:[#allocation7 + $0x138] sm:$0xff]  ;;  %v781_v34 = vld [vmem:[#allocation7 + $0x148] sm:$0xff] }
  0x81   :  { %2667 = vmatpush3.bf16.msra.mxu1 %v2664_v36  ;;  %v503_v36 = vlaneseq  ;;  %v2748_v32 = vpack.c.bf16 %v779_v31, %v778_v30  ;;  %v1000_v30 = vld [vmem:[%s3758_s8 + $0x18] sm:$0xff] }
  0x82   :  { %2669 = vmatprep.subr.bf16.mxu1 %v2668_v39 }
  0x83   :  { %2646 = vmatpush3.bf16.msra.mxu0 %v2645_v16  ;;  %v549_v16 = vld [vmem:[#allocation7 + $0x98] sm:$0xff]  ;;  %v3409_v37 = vshrl.u32 %v503_v36, 7  ;;  %v782_v36 = vld [vmem:[#allocation7 + $0x150] sm:$0xff] }
  0x84   :  { %2647 = vmatprep.subr.bf16.mxu0 %v3174_v0  ;;  %v2700_v17 = vpack.c.bf16 %v549_v16, %v548_v15 }
  0x85   :  { %2671 = vmatpush3.bf16.msra.mxu1 %v2668_v39  ;;  %v3412_v38 = vsub.s32 0, %v3409_v37 }
  0x86   :  { %2673 = vmatprep.subr.bf16.mxu1 %v2672_v42 }
  0x87   :  { %2649 = vmatpush3.bf16.msra.mxu0 %v2648_v19  ;;  %v551_v19 = vld [vmem:[#allocation7 + $0xa8] sm:$0xff] }
  0x88   :  { %2650 = vmatprep.subr.bf16.mxu0 %v3174_v0  ;;  %v2704_v20 = vpack.c.bf16 %v551_v19, %v550_v18 }
  0x89   :  { %2675 = vmatpush3.bf16.msra.mxu1 %v2672_v42 }
  0x8a   :  { %2677 = vmatprep.subr.bf16.mxu1 %v2676_v45 }
  0x8b   :  { %2652 = vmatpush3.bf16.msra.mxu0 %v2651_v22  ;;  %v553_v22 = vld [vmem:[#allocation7 + $0xb8] sm:$0xff] }
  0x8c   :  { %2653 = vmatprep.subr.bf16.mxu0 %v3174_v0  ;;  %v2708_v23 = vpack.c.bf16 %v553_v22, %v552_v21  ;;  %v772_v21 = vld [vmem:[#allocation7 + $0x100] sm:$0xff]  ;;  %v773_v22 = vld [vmem:[#allocation7 + $0x108] sm:$0xff] }
  0x8d   :  { %2679 = vmatpush3.bf16.msra.mxu1 %v2676_v45 }
  0x8e   :  { %2681 = vmatprep.subr.bf16.mxu1 %v2680_v48 }
  0x8f   :  { %2655 = vmatpush3.bf16.msra.mxu0 %v2654_v25  ;;  %v555_v25 = vld [vmem:[#allocation7 + $0xc8] sm:$0xff] }
  0x91   :  { %2683 = vmatpush3.bf16.msra.mxu1 %v2680_v48 }
  0x92   :  { %2333 = vmatmul.mubr.f32.vlgmr.msra.gmra.mrb[0].mxu0 %v129_v26  ;;  %2685 = vmatprep.subr.bf16.mxu1 %v2684_v51  ;;  %v2712_v26 = vpack.c.bf16 %v555_v25, %v554_v24  ;;  %v774_v24 = vld [vmem:[#allocation7 + $0x110] sm:$0xff]  ;;  %v775_v25 = vld [vmem:[#allocation7 + $0x118] sm:$0xff] }
  0x93   :  { %2337 = vmatprep.mubr.msk.f32.mxu0 %vm220_vm1, %v216_v27  ;;  %v556_v27 = vld [vmem:[#allocation7 + $0xd0] sm:$0xff] }
  0x94   :  { %v2716_v29 = vpack.c.bf16 %v557_v28, %v556_v27  ;;  %v776_v27 = vld [vmem:[#allocation7 + $0x120] sm:$0xff]  ;;  %v777_v28 = vld [vmem:[#allocation7 + $0x128] sm:$0xff] }
  0x95   :  { %2687 = vmatpush3.bf16.msra.mxu1 %v2684_v51 }
  0x96   :  { %2697 = vmatprep.subr.bf16.mxu1 %v2696_v14 }
 0x165   :  { %v212_v52 = vpop.f32.mrb[0].mxu0 }
 0x166   :  { %v2334_v54 = vpop.f32.mrb[1].mxu0  ;;  %2335 = vmatprep.subr.mxu0 %v212_v52 }
 0x167   :  { %2336 = vmatpush3.msra.mxu0 %v212_v52  ;;  %v2103_v52 = vld [vmem:[%s3756_s6] ss:$0 sm:$0xff] }
 0x168   :  { %2338 = vmatmul.mubr.msk.f32.vlgmr.msra.gmra.mrb[2].mxu0 %vm220_vm1, %v217_v53 }
 0x169   :  { %2340 = vmatprep.mubr.msk.f32.mxu0 %vm220_vm1, %v218_v55 }
 0x16c   :  { %2341 = vmatmul.mubr.msk.f32.gmra.mrb[4].mxu0 %vm220_vm1, %v219_v56 }
 0x16d   :  { %493 = vmatprep.mubr.f32.mxu0 %v3176_v1 }
 0x23b   :  { %v2339_v57 = vpop.f32.mrb[2].mxu0 }
 0x23c   :  { %v299_v58 = vpop.f32.mrb[3].mxu0 }
 0x23d   :  { %2375 = vmatprep.mubr.f32.mxu1 %v299_v58 }
 0x23e   :  { %2376 = vmatmul.mubr.f32.vlgmr.msra.gmra.mrb[0].mxu1 %v2339_v57  ;;  %v2104_v57 = vld [vmem:[#allocation8] ss:$0 sm:$0xff] }
 0x23f   :  { %v2342_v59 = vpop.f32.mrb[4].mxu0  ;;  %2699 = vmatpush3.bf16.msra.mxu1 %v2696_v14 }
 0x240   :  { %v309_v60 = vpop.f32.mrb[5].mxu0  ;;  %2701 = vmatprep.subr.bf16.mxu1 %v2700_v17 }
 0x241   :  { %2378 = vmatprep.mubr.f32.mxu1 %v309_v60 }
 0x242   :  { %2379 = vmatmul.mubr.f32.gmra.mrb[2].mxu1 %v2342_v59 }
 0x243   :  { %2703 = vmatpush3.bf16.msra.mxu1 %v2700_v17 }
 0x244   :  { %2705 = vmatprep.subr.bf16.mxu1 %v2704_v20 }
 0x247   :  { %2707 = vmatpush3.bf16.msra.mxu1 %v2704_v20 }
 0x248   :  { %2709 = vmatprep.subr.bf16.mxu1 %v2708_v23 }
 0x24b   :  { %2711 = vmatpush3.bf16.msra.mxu1 %v2708_v23  ;;  %v2736_v23 = vpack.c.bf16 %v773_v22, %v772_v21 }
 0x24c   :  { %2713 = vmatprep.subr.bf16.mxu1 %v2712_v26 }
 0x24f   :  { %2715 = vmatpush3.bf16.msra.mxu1 %v2712_v26  ;;  %v2740_v26 = vpack.c.bf16 %v775_v25, %v774_v24 }
 0x250   :  { %2717 = vmatprep.subr.bf16.mxu1 %v2716_v29 }
 0x253   :  { %2719 = vmatpush3.bf16.msra.mxu1 %v2716_v29  ;;  %v2744_v29 = vpack.c.bf16 %v777_v28, %v776_v27 }
 0x254   :  { %2721 = vmatprep.subr.bf16.mxu1 %v2720_v33 }
 0x257   :  { %2723 = vmatpush3.bf16.msra.mxu1 %v2720_v33  ;;  %v780_v33 = vld [vmem:[#allocation7 + $0x140] sm:$0xff] }
 0x258   :  { %2725 = vmatprep.subr.bf16.mxu1 %v2724_v35 }
 0x25b   :  { %2727 = vmatpush3.bf16.msra.mxu1 %v2724_v35  ;;  %v2752_v35 = vpack.c.bf16 %v781_v34, %v780_v33  ;;  %v999_v33 = vld [vmem:[%s3758_s8 + $0x10] sm:$0xff]  ;;  %v1002_v34 = vld [vmem:[%s3758_s8 + $0x28] sm:$0xff] }
 0x311   :  { %v3386_v61 = vpop.f32.mrb[0].mxu1 }
 0x312   :  { %v422_v62 = vmul.f32 %v3386_v61, %v3386_v61  ;;  %v3390_v63 = vpop.f32.mrb[1].mxu1 }
 0x313   :  { %v421_v2 = vmul.f32 %v3390_v63, %v3390_v63  ;;  %v2690_v3 = vpack.c.bf16 %v3386_v61, %v3390_v63 }
 0x315   :  { %v3396_v4 = vpop.f32.mrb[2].mxu1  ;;  %v2688_v5 = vpack.c.bf16 %v422_v62, %v421_v2 }
 0x316   :  { %v424_v6 = vmul.f32 %v3396_v4, %v3396_v4  ;;  %v3400_v7 = vpop.f32.mrb[3].mxu1 }
 0x317   :  { %v423_v8 = vmul.f32 %v3400_v7, %v3400_v7  ;;  %v2694_v9 = vpack.c.bf16 %v3396_v4, %v3400_v7  ;;  %2689 = vmatprep.subr.bf16.mxu0 %v2688_v5 }
 0x318   :  { %2691 = vmatpush1.bf16.msra.mxu0 %v2690_v3 }
 0x319   :  { %v2692_v10 = vpack.c.bf16 %v424_v6, %v423_v8 }
 0x31b   :  { %2693 = vmatprep.subr.bf16.mxu0 %v2692_v10 }
 0x31c   :  { %2695 = vmatpush1.bf16.msra.mxu0 %v2694_v9 }
 0x31f   :  { %2102 = vmatmul.mubr.msk.f32.vlgmr.msra.gmra.mrb[6].mxu0 %vm425_vm2, %v3177_v11 }
 0x320   :  { %719 = vmatprep.mubr.f32.mxu0 %v3176_v1 }
 0x3f2   :  { %v495_v39 = vpop.f32.mrb[6].mxu0 }
 0x3f3   :  { %v500_v40 = vmul.f32 %v495_v39, %v495_v39  ;;  %v506_v41 = vrot.slane %v495_v39, %v3412_v38  ;;  %v497_v42 = vpop.f32.mrb[7].mxu0  ;;  %v783_v39 = vld [vmem:[#allocation7 + $0x158] sm:$0xff] }
 0x3f5   :  { %v507_v43 = vsub.f32 %v3390_v63, %v506_v41  ;;  %v508_v44 = vsub.f32 %v3386_v61, %v506_v41  ;;  %v509_v45 = vsub.f32 %v3400_v7, %v506_v41  ;;  %v510_v46 = vsub.f32 %v3396_v4, %v506_v41  ;;  %v784_v41 = vld [vmem:[#allocation7 + $0x160] sm:$0xff] }
 0x3f6   :  { %v501_v47 = vsub.f32 %v497_v42, %v500_v40  ;;  %v2756_v40 = vpack.c.bf16 %v783_v39, %v782_v36  ;;  %v785_v42 = vld [vmem:[#allocation7 + $0x168] sm:$0xff]  ;;  %v1001_v39 = vld [vmem:[%s3758_s8 + $0x20] sm:$0xff] }
 0x3f8   :  { %v502_v48 = vmax.f32 %v501_v47, 0.0 }
 0x3fa   :  { %v511_v49 = vadd.f32 1e-05, %v502_v48 }
 0x3fc   :  { %2954 = vrsqrt.f32 %v511_v49 }
 0x406   :  { %v2955_v50 = vpop.eup %2954 }
 0x407   :  { %v516_v51 = vrot.slane %v2955_v50, %v3412_v38 }
 0x409   :  { %v517_v53 = vmul.f32 %v516_v51, %v507_v43  ;;  %v518_v54 = vmul.f32 %v516_v51, %v508_v44  ;;  %v519_v55 = vmul.f32 %v516_v51, %v509_v45  ;;  %v520_v56 = vmul.f32 %v516_v51, %v510_v46  ;;  %v786_v43 = vld [vmem:[#allocation7 + $0x170] sm:$0xff]  ;;  %v787_v45 = vld [vmem:[#allocation7 + $0x178] sm:$0xff] }
 0x40a   :  { %v2760_v44 = vpack.c.bf16 %v785_v42, %v784_v41  ;;  %v2764_v46 = vpack.c.bf16 %v787_v45, %v786_v43  ;;  %v1006_v42 = vld [vmem:[%s3758_s8 + $0x48] sm:$0xff]  ;;  %v1008_v43 = vld [vmem:[%s3758_s8 + $0x58] sm:$0xff]  ;;  %v1005_v45 = vld [vmem:[%s3758_s8 + $0x40] sm:$0xff] }
 0x40b   :  { %v527_v58 = vmul.f32 %v2103_v52, %v517_v53  ;;  %v528_v59 = vmul.f32 %v2103_v52, %v518_v54  ;;  %v529_v60 = vmul.f32 %v2103_v52, %v519_v55  ;;  %v530_v61 = vmul.f32 %v2103_v52, %v520_v56 }
 0x40d   :  { %v538_v62 = vadd.f32 %v2104_v57, %v528_v59  ;;  %v537_v63 = vadd.f32 %v2104_v57, %v527_v58  ;;  %v539_v2 = vadd.f32 %v2104_v57, %v529_v60  ;;  %v540_v3 = vadd.f32 %v2104_v57, %v530_v61  ;;  %v2107_v60 = vld [vmem:[%s3756_s6 + $0x1] ss:$0 sm:$0xff] }
 0x40f   :  { %2956 = vtanh.f32 %v538_v62 }
 0x410   :  { %2958 = vtanh.f32 %v537_v63 }
 0x411   :  { %2960 = vtanh.f32 %v539_v2 }
 0x412   :  { %2962 = vtanh.f32 %v540_v3  ;;  %v2108_v3 = vld [vmem:[#allocation8 + $0x1] ss:$0 sm:$0xff] }
 0x419   :  { %v2957_v4 = vpop.eup %2956 }
 0x41a   :  { %v2959_v5 = vpop.eup %2958 }
 0x41b   :  { %2413 = vmatprep.mubr.f32.mxu1 %v2959_v5  ;;  %v2961_v6 = vpop.eup %2960 }
 0x41c   :  { %2414 = vmatmul.mubr.f32.vlgmr.msra.gmra.mrb[4].mxu1 %v2957_v4  ;;  %v2963_v7 = vpop.eup %2962 }
 0x41d   :  { %2416 = vmatprep.mubr.f32.mxu1 %v2961_v6 }
 0x420   :  { %2417 = vmatmul.mubr.f32.gmra.mrb[6].mxu1 %v2963_v7 }
 0x421   :  { %945 = vmatprep.mubr.f32.mxu1 %v3176_v1 }
 0x4ef   :  { %v3424_v8 = vpop.f32.mrb[4].mxu1 }
 0x4f0   :  { %v652_v9 = vmul.f32 %v3424_v8, %v3424_v8  ;;  %v3428_v10 = vpop.f32.mrb[5].mxu1 }
 0x4f1   :  { %v651_v12 = vmul.f32 %v3428_v10, %v3428_v10  ;;  %v2730_v13 = vpack.c.bf16 %v3424_v8, %v3428_v10 }
 0x4f3   :  { %v3434_v14 = vpop.f32.mrb[6].mxu1  ;;  %v2728_v15 = vpack.c.bf16 %v652_v9, %v651_v12 }
 0x4f4   :  { %v654_v16 = vmul.f32 %v3434_v14, %v3434_v14  ;;  %v3438_v17 = vpop.f32.mrb[7].mxu1 }
 0x4f5   :  { %v653_v18 = vmul.f32 %v3438_v17, %v3438_v17  ;;  %v2734_v19 = vpack.c.bf16 %v3434_v14, %v3438_v17  ;;  %2729 = vmatprep.subr.bf16.mxu0 %v2728_v15 }
 0x4f6   :  { %2731 = vmatpush1.bf16.msra.mxu0 %v2730_v13 }
 0x4f7   :  { %v2732_v20 = vpack.c.bf16 %v654_v16, %v653_v18 }
 0x4f9   :  { %2733 = vmatprep.subr.bf16.mxu0 %v2732_v20 }
 0x4fa   :  { %2735 = vmatpush1.bf16.msra.mxu0 %v2734_v19 }
 0x4fb   :  { %2737 = vmatprep.subr.bf16.mxu0 %v2736_v23 }
 0x4fd   :  { %2106 = vmatmul.mubr.msk.f32.vlgmr.msra.gmra.mrb[8].mxu0 %vm425_vm2, %v3177_v11 }
 0x4fe   :  { %2739 = vmatpush3.bf16.msra.mxu0 %v2736_v23 }
 0x4ff   :  { %2741 = vmatprep.subr.bf16.mxu0 %v2740_v26 }
 0x502   :  { %2743 = vmatpush3.bf16.msra.mxu0 %v2740_v26 }
 0x503   :  { %2745 = vmatprep.subr.bf16.mxu0 %v2744_v29 }
 0x506   :  { %2747 = vmatpush3.bf16.msra.mxu0 %v2744_v29  ;;  %v998_v29 = vld [vmem:[%s3758_s8 + $0x8] sm:$0xff] }
 0x507   :  { %2749 = vmatprep.subr.bf16.mxu0 %v2748_v32  ;;  %v2776_v31 = vpack.c.bf16 %v1000_v30, %v998_v29 }
 0x50a   :  { %2751 = vmatpush3.bf16.msra.mxu0 %v2748_v32  ;;  %v997_v32 = vld [vmem:[%s3758_s8] sm:$0xff] }
 0x50b   :  { %2753 = vmatprep.subr.bf16.mxu0 %v2752_v35 }
 0x50e   :  { %2755 = vmatpush3.bf16.msra.mxu0 %v2752_v35  ;;  %v1004_v35 = vld [vmem:[%s3758_s8 + $0x38] sm:$0xff] }
 0x50f   :  { %2757 = vmatprep.subr.bf16.mxu0 %v2756_v40  ;;  %v2780_v36 = vpack.c.bf16 %v1004_v35, %v1002_v34 }
 0x512   :  { %2759 = vmatpush3.bf16.msra.mxu0 %v2756_v40  ;;  %v1003_v40 = vld [vmem:[%s3758_s8 + $0x30] sm:$0xff] }
 0x513   :  { %2761 = vmatprep.subr.bf16.mxu0 %v2760_v44  ;;  %v2782_v41 = vpack.c.bf16 %v1003_v40, %v1001_v39 }
 0x516   :  { %2763 = vmatpush3.bf16.msra.mxu0 %v2760_v44  ;;  %v2784_v44 = vpack.c.bf16 %v1008_v43, %v1006_v42 }
 0x517   :  { %2765 = vmatprep.subr.bf16.mxu0 %v2764_v46 }
 0x51a   :  { %2767 = vmatpush3.bf16.msra.mxu0 %v2764_v46  ;;  %v1007_v46 = vld [vmem:[%s3758_s8 + $0x50] sm:$0xff] }
 0x5d0   :  { %v721_v47 = vpop.f32.mrb[8].mxu0 }
 0x5d1   :  { %v726_v48 = vmul.f32 %v721_v47, %v721_v47  ;;  %v732_v49 = vrot.slane %v721_v47, %v3412_v38  ;;  %v723_v50 = vpop.f32.mrb[9].mxu0  ;;  %v2786_v47 = vpack.c.bf16 %v1007_v46, %v1005_v45 }
 0x5d3   :  { %v733_v51 = vsub.f32 %v3428_v10, %v732_v49  ;;  %v734_v52 = vsub.f32 %v3424_v8, %v732_v49  ;;  %v735_v53 = vsub.f32 %v3438_v17, %v732_v49  ;;  %v736_v54 = vsub.f32 %v3434_v14, %v732_v49  ;;  %v1012_v49 = vld [vmem:[%s3758_s8 + $0x78] sm:$0xff] }
 0x5d4   :  { %v727_v55 = vsub.f32 %v723_v50, %v726_v48  ;;  %v1010_v48 = vld [vmem:[%s3758_s8 + $0x68] sm:$0xff] }
 0x5d5   :  { %v2788_v50 = vpack.c.bf16 %v1012_v49, %v1010_v48  ;;  %v1205_v49 = vld [vmem:[%s3753_s3] sm:$0xff] }
 0x5d6   :  { %v728_v56 = vmax.f32 %v727_v55, 0.0  ;;  %v1016_v55 = vld [vmem:[%s3758_s8 + $0x98] sm:$0xff] }
 0x5d8   :  { %v737_v57 = vadd.f32 1e-05, %v728_v56 }
 0x5da   :  { %2964 = vrsqrt.f32 %v737_v57  ;;  %v1013_v57 = vld [vmem:[%s3758_s8 + $0x80] sm:$0xff] }
 0x5e4   :  { %v2965_v58 = vpop.eup %2964 }
 0x5e5   :  { %v742_v59 = vrot.slane %v2965_v58, %v3412_v38  ;;  %v1015_v58 = vld [vmem:[%s3758_s8 + $0x90] sm:$0xff] }
 0x5e7   :  { %v743_v61 = vmul.f32 %v742_v59, %v733_v51  ;;  %v744_v62 = vmul.f32 %v742_v59, %v734_v52  ;;  %v745_v63 = vmul.f32 %v742_v59, %v735_v53  ;;  %v746_v2 = vmul.f32 %v742_v59, %v736_v54  ;;  %v1009_v51 = vld [vmem:[%s3758_s8 + $0x60] sm:$0xff]  ;;  %v1011_v52 = vld [vmem:[%s3758_s8 + $0x70] sm:$0xff]  ;;  %v1014_v54 = vld [vmem:[%s3758_s8 + $0x88] sm:$0xff] }
 0x5e8   :  { %v2790_v53 = vpack.c.bf16 %v1011_v52, %v1009_v51  ;;  %v2792_v56 = vpack.c.bf16 %v1016_v55, %v1014_v54  ;;  %v2794_v59 = vpack.c.bf16 %v1015_v58, %v1013_v57  ;;  %v1029_v51 = vld [vmem:[#allocation10] sm:$0x3]  ;;  %v1037_v52 = vsub.s32 1, %v3409_v37 }
 0x5e9   :  { %v753_v4 = vmul.f32 %v2107_v60, %v743_v61  ;;  %v754_v5 = vmul.f32 %v2107_v60, %v744_v62  ;;  %v755_v6 = vmul.f32 %v2107_v60, %v745_v63  ;;  %v756_v7 = vmul.f32 %v2107_v60, %v746_v2  ;;  %v1018_v60 = vld [vmem:[%s3758_s8 + $0xa8] sm:$0xff]  ;;  %v1020_v61 = vld [vmem:[%s3758_s8 + $0xb8] sm:$0xff]  ;;  %v1017_v63 = vld [vmem:[%s3758_s8 + $0xa0] sm:$0xff] }
 0x5ea   :  { %v2796_v62 = vpack.c.bf16 %v1020_v61, %v1018_v60  ;;  %v1019_v2 = vld [vmem:[%s3758_s8 + $0xb0] sm:$0xff]  ;;  %v1034_v54 = vrot.slane %v1029_v51, %v3412_v38 }
 0x5eb   :  { %v764_v8 = vadd.f32 %v2108_v3, %v754_v5  ;;  %v763_v9 = vadd.f32 %v2108_v3, %v753_v4  ;;  %v765_v10 = vadd.f32 %v2108_v3, %v755_v6  ;;  %v766_v12 = vadd.f32 %v2108_v3, %v756_v7  ;;  %v1022_v4 = vld [vmem:[%s3758_s8 + $0xc8] sm:$0xff]  ;;  %v1024_v5 = vld [vmem:[%s3758_s8 + $0xd8] sm:$0xff]  ;;  %v1021_v6 = vld [vmem:[%s3758_s8 + $0xc0] sm:$0xff] }
 0x5ec   :  { %v2798_v3 = vpack.c.bf16 %v1019_v2, %v1017_v63  ;;  %v2800_v7 = vpack.c.bf16 %v1024_v5, %v1022_v4 }
 0x5ed   :  { %2966 = vtanh.f32 %v764_v8  ;;  %v1023_v8 = vld [vmem:[%s3758_s8 + $0xd0] sm:$0xff] }
 0x5ee   :  { %2968 = vtanh.f32 %v763_v9  ;;  %v1026_v9 = vld [vmem:[%s3758_s8 + $0xe8] sm:$0xff] }
 0x5ef   :  { %2970 = vtanh.f32 %v765_v10  ;;  %v1028_v10 = vld [vmem:[%s3758_s8 + $0xf8] sm:$0xff] }
 0x5f0   :  { %2972 = vtanh.f32 %v766_v12  ;;  %v2802_v12 = vpack.c.bf16 %v1023_v8, %v1021_v6 }
 0x5f7   :  { %v2967_v13 = vpop.eup %2966 }
 0x5f8   :  { %v2969_v14 = vpop.eup %2968 }
 0x5f9   :  { %2451 = vmatprep.mubr.f32.mxu0 %v2969_v14  ;;  %v2971_v15 = vpop.eup %2970  ;;  %v1025_v14 = vld [vmem:[%s3758_s8 + $0xe0] sm:$0xff] }
 0x5fa   :  { %2452 = vmatmul.mubr.f32.vlgmr.msra.gmra.mrb[10].mxu0 %v2967_v13  ;;  %v2973_v16 = vpop.eup %2972  ;;  %v2804_v13 = vpack.c.bf16 %v1028_v10, %v1026_v9 }
 0x5fb   :  { %2454 = vmatprep.mubr.f32.mxu0 %v2971_v15  ;;  %v1027_v15 = vld [vmem:[%s3758_s8 + $0xf0] sm:$0xff] }
 0x5fe   :  { %2455 = vmatmul.mubr.f32.gmra.mrb[12].mxu0 %v2973_v16  ;;  %v2806_v16 = vpack.c.bf16 %v1027_v15, %v1025_v14  ;;  %v1214_v14 = vld [vmem:[#allocation11 + $0x8] sm:$0xff]  ;;  %v1130_v15 = vld [vmem:[#allocation2] sm:$0xff] }
 0x5ff   :  { %1198 = vmatprep.mubr.f32.mxu0 %v3176_v1 }
 0x6cd   :  { %v3456_v17 = vpop.f32.mrb[10].mxu0 }
 0x6ce   :  { %v878_v18 = vmul.f32 %v3456_v17, %v3456_v17  ;;  %v3460_v19 = vpop.f32.mrb[11].mxu0 }
 0x6cf   :  { %v877_v20 = vmul.f32 %v3460_v19, %v3460_v19  ;;  %v2770_v21 = vpack.c.bf16 %v3456_v17, %v3460_v19 }
 0x6d1   :  { %v3466_v22 = vpop.f32.mrb[12].mxu0  ;;  %v2768_v23 = vpack.c.bf16 %v878_v18, %v877_v20 }
 0x6d2   :  { %v880_v24 = vmul.f32 %v3466_v22, %v3466_v22  ;;  %v3470_v25 = vpop.f32.mrb[13].mxu0 }
 0x6d3   :  { %v879_v26 = vmul.f32 %v3470_v25, %v3470_v25  ;;  %v2774_v27 = vpack.c.bf16 %v3466_v22, %v3470_v25  ;;  %2769 = vmatprep.subr.bf16.mxu1 %v2768_v23 }
 0x6d4   :  { %2771 = vmatpush1.bf16.msra.mxu1 %v2770_v21 }
 0x6d5   :  { %v2772_v28 = vpack.c.bf16 %v880_v24, %v879_v26 }
 0x6d7   :  { %2773 = vmatprep.subr.bf16.mxu1 %v2772_v28 }
 0x6d8   :  { %2775 = vmatpush1.bf16.msra.mxu1 %v2774_v27 }
 0x6d9   :  { %2777 = vmatprep.subr.bf16.mxu1 %v2776_v31 }
 0x6db   :  { %2110 = vmatmul.mubr.msk.f32.vlgmr.msra.gmra.mrb[8].mxu1 %vm425_vm2, %v3177_v11  ;;  %v2778_v11 = vpack.c.bf16 %v999_v33, %v997_v32 }
 0x6dc   :  { %1105 = vmatprep.mubr.f32.mxu1 %v3176_v1 }
 0x6dd   :  { %2779 = vmatpush1.bf16.msra.mxu1 %v2778_v11  ;;  %v2111_v11 = vld [vmem:[%s3756_s6 + $0x2] ss:$0 sm:$0xff]  ;;  %s2086_s6 = sshll.u32 %s3180_s5, 4  ;;  %s2087_s6 = int_to_ptr.vmem [resolvable:$true] %s2086_s6 }
 0x6de   :  { %2781 = vmatprep.subr.bf16.mxu1 %v2780_v36  ;;  %p3137_p7 = scmp.lt.s32.totalorder %s2087_s6, %s2087_s6 }
 0x6e1   :  { %2783 = vmatpush1.bf16.msra.mxu1 %v2782_v41 }
 0x6e2   :  { %2785 = vmatprep.subr.bf16.mxu1 %v2784_v44 }
 0x6e5   :  { %2787 = vmatpush1.bf16.msra.mxu1 %v2786_v47 }
 0x6e6   :  { %2789 = vmatprep.subr.bf16.mxu1 %v2788_v50  ;;  %v3178_v50 = vmov 0  }
 0x6e7   :  { %2953 = vset.pattern.permute.xlu0 %v3178_v50 }
 0x6e8   :  { %1208 = vperm.xlu0 %2953, %v1205_v49   ;;  %v1408_v49 = vld [vmem:[#allocation11 + $0x88] sm:$0xff] }
 0x6e9   :  { %2791 = vmatpush1.bf16.msra.mxu1 %v2790_v53 }
 0x6ea   :  { %2793 = vmatprep.subr.bf16.mxu1 %v2792_v56  ;;  %v1038_v56 = vrot.slane %v1029_v51, %v1037_v52  ;;  %v1409_v51 = vld [vmem:[#allocation11 + $0x90] sm:$0xff]  ;;  %v1410_v52 = vld [vmem:[#allocation11 + $0x98] sm:$0xff] }
 0x6ed   :  { %2795 = vmatpush1.bf16.msra.mxu1 %v2794_v59 }
 0x6ee   :  { %2797 = vmatprep.subr.bf16.mxu1 %v2796_v62 }
 0x6f1   :  { %2799 = vmatpush1.bf16.msra.mxu1 %v2798_v3 }
 0x6f2   :  { %2801 = vmatprep.subr.bf16.mxu1 %v2800_v7 }
 0x6f5   :  { %2803 = vmatpush1.bf16.msra.mxu1 %v2802_v12 }
 0x6f6   :  { %2805 = vmatprep.subr.bf16.mxu1 %v2804_v13  ;;  %v1213_v13 = vld [vmem:[#allocation11] sm:$0xff] }
 0x6f9   :  { %2807 = vmatpush1.bf16.msra.mxu1 %v2806_v16  ;;  %v2817_v16 = vpack.c.bf16 %v1214_v14, %v1213_v13 }
 0x7ae   :  { %v947_v18 = vpop.f32.mrb[8].mxu1 }
 0x7af   :  { %v952_v20 = vmul.f32 %v947_v18, %v947_v18  ;;  %v958_v21 = vrot.slane %v947_v18, %v3412_v38  ;;  %v949_v23 = vpop.f32.mrb[9].mxu1  ;;  %v1215_v18 = vld [vmem:[#allocation11 + $0x10] sm:$0xff] }
 0x7b1   :  { %v959_v24 = vsub.f32 %v3460_v19, %v958_v21  ;;  %v960_v26 = vsub.f32 %v3456_v17, %v958_v21  ;;  %v961_v27 = vsub.f32 %v3470_v25, %v958_v21  ;;  %v962_v28 = vsub.f32 %v3466_v22, %v958_v21  ;;  %v2112_v17 = vld [vmem:[#allocation8 + $0x2] ss:$0 sm:$0xff] }
 0x7b2   :  { %v953_v29 = vsub.f32 %v949_v23, %v952_v20  ;;  %v1216_v20 = vld [vmem:[#allocation11 + $0x18] sm:$0xff]  ;;  %v1217_v23 = vld [vmem:[#allocation11 + $0x20] sm:$0xff] }
 0x7b3   :  { %v2820_v21 = vpack.c.bf16 %v1216_v20, %v1215_v18 }
 0x7b4   :  { %v954_v30 = vmax.f32 %v953_v29, 0.0 }
 0x7b6   :  { %v963_v31 = vadd.f32 1e-05, %v954_v30  ;;  %v1221_v30 = vld [vmem:[#allocation11 + $0x40] sm:$0xff] }
 0x7b8   :  { %2974 = vrsqrt.f32 %v963_v31  ;;  %v1222_v31 = vld [vmem:[#allocation11 + $0x48] sm:$0xff] }
 0x7c2   :  { %v2975_v32 = vpop.eup %2974 }
 0x7c3   :  { %v968_v33 = vrot.slane %v2975_v32, %v3412_v38  ;;  %v2829_v32 = vpack.c.bf16 %v1222_v31, %v1221_v30 }
 0x7c5   :  { %v969_v34 = vmul.f32 %v968_v33, %v959_v24  ;;  %v970_v35 = vmul.f32 %v968_v33, %v960_v26  ;;  %v971_v19 = vmul.f32 %v968_v33, %v961_v27  ;;  %v972_v36 = vmul.f32 %v968_v33, %v962_v28  ;;  %v1218_v24 = vld [vmem:[#allocation11 + $0x28] sm:$0xff]  ;;  %v1219_v27 = vld [vmem:[#allocation11 + $0x30] sm:$0xff]  ;;  %v1220_v28 = vld [vmem:[#allocation11 + $0x38] sm:$0xff] }
 0x7c6   :  { %v2823_v26 = vpack.c.bf16 %v1218_v24, %v1217_v23  ;;  %v2826_v29 = vpack.c.bf16 %v1220_v28, %v1219_v27  ;;  %v1223_v33 = vld [vmem:[#allocation11 + $0x50] sm:$0xff] }
 0x7c7   :  { %v979_v39 = vmul.f32 %v2111_v11, %v969_v34  ;;  %v980_v25 = vmul.f32 %v2111_v11, %v970_v35  ;;  %v981_v22 = vmul.f32 %v2111_v11, %v971_v19  ;;  %v982_v42 = vmul.f32 %v2111_v11, %v972_v36  ;;  %v1224_v11 = vld [vmem:[#allocation11 + $0x58] sm:$0xff]  ;;  %v1225_v35 = vld [vmem:[#allocation11 + $0x60] sm:$0xff]  ;;  %v1226_v19 = vld [vmem:[#allocation11 + $0x68] sm:$0xff] }
 0x7c8   :  { %v2832_v34 = vpack.c.bf16 %v1224_v11, %v1223_v33  ;;  %v2835_v36 = vpack.c.bf16 %v1226_v19, %v1225_v35  ;;  %v2115_v23 = vld [vmem:[%s3761_s11] ss:$0 sm:$0xff]  ;;  %v1600_v33 = vld [vmem:[#allocation11 + $0x100] sm:$0xff]  ;;  %v1601_v11 = vld [vmem:[#allocation11 + $0x108] sm:$0xff] }
 0x7c9   :  { %v989_v40 = vadd.f32 %v2112_v17, %v979_v39  ;;  %v990_v41 = vadd.f32 %v2112_v17, %v980_v25  ;;  %v991_v43 = vadd.f32 %v2112_v17, %v981_v22  ;;  %v992_v44 = vadd.f32 %v2112_v17, %v982_v42  ;;  %v1227_v17 = vld [vmem:[#allocation11 + $0x70] sm:$0xff]  ;;  %v1228_v39 = vld [vmem:[#allocation11 + $0x78] sm:$0xff] }
 0x7ca   :  { %v2838_v25 = vpack.c.bf16 %v1228_v39, %v1227_v17  ;;  %v1602_v35 = vld [vmem:[#allocation11 + $0x110] sm:$0xff]  ;;  %v1603_v19 = vld [vmem:[#allocation11 + $0x118] sm:$0xff]  ;;  %v1604_v17 = vld [vmem:[#allocation11 + $0x120] sm:$0xff] }
 0x7cb   :  { %2976 = vtanh.f32 %v989_v40  ;;  %v1209_v40 = vpop.permute.xlu0 %1208  ;;  %v1605_v39 = vld [vmem:[#allocation11 + $0x128] sm:$0xff] }
 0x7cc   :  { %2978 = vtanh.f32 %v990_v41 }
 0x7cd   :  { %2980 = vtanh.f32 %v991_v43 }
 0x7ce   :  { %2982 = vtanh.f32 %v992_v44 }
 0x7d5   :  { %v2977_v45 = vpop.eup %2976 }
 0x7d6   :  { %1106 = vmatmul.mubr.f32.vlgmr.msra.gmra.mrb[10].mxu1 %v2977_v45  ;;  %v2979_v46 = vpop.eup %2978 }
 0x7d7   :  { %1111 = vmatprep.mubr.f32.mxu1 %v3176_v1  ;;  %v2981_v47 = vpop.eup %2980 }
 0x7d8   :  { %v2983_v48 = vpop.eup %2982 }
 0x7da   :  { %1112 = vmatmul.mubr.f32.gmra.mrb[12].mxu1 %v2979_v46 }
 0x7db   :  { %1117 = vmatprep.mubr.f32.mxu1 %v3176_v1 }
 0x7de   :  { %1118 = vmatmul.mubr.f32.gmra.mrb[14].mxu1 %v2981_v47  ;;  %v3179_v47 = vmov 0.125  }
 0x7df   :  { %1123 = vmatprep.mubr.f32.mxu1 %v3176_v1 }
 0x7e2   :  { %1124 = vmatmul.mubr.f32.gmra.mrb[16].mxu1 %v2983_v48  ;;  %v1407_v48 = vld [vmem:[#allocation11 + $0x80] sm:$0xff] }
 0x7e3   :  { %1369 = vmatprep.mubr.f32.mxu1 %v3176_v1  ;;  %v2841_v50 = vpack.c.bf16 %v1408_v49, %v1407_v48  ;;  %v1612_v48 = vld [vmem:[#allocation11 + $0x160] sm:$0xff] }
 0x8a9   :  { %v1107_v53 = vpop.f32.mrb[10].mxu1 }
 0x8aa   :  { %v1109_v55 = vpop.f32.mrb[11].mxu1  ;;  %v1108_v58 = vadd.f32 %v1107_v53, %v1034_v54  ;;  %v2844_v53 = vpack.c.bf16 %v1410_v52, %v1409_v51  ;;  %v1614_v52 = vld [vmem:[#allocation11 + $0x170] sm:$0xff] }
 0x8ab   :  { %v1110_v61 = vadd.f32 %v1109_v55, %v1038_v56  ;;  %v1412_v55 = vld [vmem:[#allocation11 + $0xa8] sm:$0xff] }
 0x8ad   :  { %v1113_v57 = vpop.f32.mrb[12].mxu1 }
 0x8ae   :  { %v1114_v59 = vadd.f32 %v1113_v57, %v1034_v54  ;;  %v1115_v60 = vpop.f32.mrb[13].mxu1  ;;  %v1413_v57 = vld [vmem:[#allocation11 + $0xb0] sm:$0xff] }
 0x8af   :  { %v1116_v62 = vadd.f32 %v1115_v60, %v1038_v56  ;;  %v1415_v60 = vld [vmem:[#allocation11 + $0xc0] sm:$0xff] }
 0x8b0   :  { %v2810_v63 = vpack.c.bf16 %v1114_v59, %v1108_v58  ;;  %v1414_v58 = vld [vmem:[#allocation11 + $0xb8] sm:$0xff] }
 0x8b1   :  { %v2808_v2 = vpack.c.bf16 %v1116_v62, %v1110_v61  ;;  %v1119_v3 = vpop.f32.mrb[14].mxu1  ;;  %v2850_v59 = vpack.c.bf16 %v1414_v58, %v1413_v57  ;;  %v1416_v61 = vld [vmem:[#allocation11 + $0xc8] sm:$0xff] }
 0x8b2   :  { %v1121_v4 = vpop.f32.mrb[15].mxu1  ;;  %v1120_v6 = vadd.f32 %v1119_v3, %v1034_v54  ;;  %v2853_v62 = vpack.c.bf16 %v1416_v61, %v1415_v60  ;;  %v1419_v3 = vld [vmem:[#allocation11 + $0xe0] sm:$0xff] }
 0x8b3   :  { %2809 = vmatprep.subr.bf16.mxu0 %v2808_v2  ;;  %v1122_v8 = vadd.f32 %v1121_v4, %v1038_v56  ;;  %v1418_v2 = vld [vmem:[#allocation11 + $0xd8] sm:$0xff] }
 0x8b4   :  { %2811 = vmatpush1.bf16.msra.mxu0 %v2810_v63  ;;  %v1417_v63 = vld [vmem:[#allocation11 + $0xd0] sm:$0xff] }
 0x8b5   :  { %v1125_v5 = vpop.f32.mrb[16].mxu1  ;;  %v2856_v4 = vpack.c.bf16 %v1418_v2, %v1417_v63 }
 0x8b6   :  { %v1126_v37 = vadd.f32 %v1125_v5, %v1034_v54  ;;  %v1127_v7 = vpop.f32.mrb[17].mxu1  ;;  %v1411_v54 = vld [vmem:[#allocation11 + $0xa0] sm:$0xff]  ;;  %v1420_v5 = vld [vmem:[#allocation11 + $0xe8] sm:$0xff] }
 0x8b7   :  { %v1128_v9 = vadd.f32 %v1127_v7, %v1038_v56  ;;  %v2847_v56 = vpack.c.bf16 %v1412_v55, %v1411_v54  ;;  %v1422_v7 = vld [vmem:[#allocation11 + $0xf8] sm:$0xff] }
 0x8b8   :  { %v2814_v10 = vpack.c.bf16 %v1126_v37, %v1120_v6  ;;  %v2859_v6 = vpack.c.bf16 %v1420_v5, %v1419_v3  ;;  %v1421_v37 = vld [vmem:[#allocation11 + $0xf0] sm:$0xff] }
 0x8b9   :  { %v2812_v12 = vpack.c.bf16 %v1128_v9, %v1122_v8  ;;  %v2862_v8 = vpack.c.bf16 %v1422_v7, %v1421_v37  ;;  %v2120_v3 = vld [vmem:[%s3761_s11 + $0x1] ss:$0 sm:$0xff] }
 0x8ba   :  { %v2121_v5 = vld [vmem:[%s3762_s12 + $0x1] ss:$0 sm:$0xff] }
 0x8bb   :  { %2813 = vmatprep.subr.bf16.mxu0 %v2812_v12 }
 0x8bc   :  { %2815 = vmatpush1.bf16.msra.mxu0 %v2814_v10 }
 0x8bd   :  { %2816 = vmatprep.subr.bf16.mxu0 %v3174_v0 }
 0x8bf   :  { %2113 = vmatmul.mubr.msk.f32.vlgmr.msra.gmra.mrb[14].mxu0 %vm425_vm2, %v1130_v15 }
 0x8c0   :  { %2818 = vmatpush3.bf16.msra.mxu0 %v2817_v16  ;;  %2489 = vmatprep.mubr.msk.f32.mxu0 %vm3175_vm0, %v3176_v1 }
 0x8c1   :  { %2819 = vmatprep.subr.bf16.mxu0 %v3174_v0 }
 0x8c4   :  { %2821 = vmatpush3.bf16.msra.mxu0 %v2820_v21 }
 0x8c5   :  { %2822 = vmatprep.subr.bf16.mxu0 %v3174_v0 }
 0x8c8   :  { %2824 = vmatpush3.bf16.msra.mxu0 %v2823_v26  ;;  %v2116_v26 = vld [vmem:[%s3762_s12] ss:$0 sm:$0xff] }
 0x8c9   :  { %2825 = vmatprep.subr.bf16.mxu0 %v3174_v0 }
 0x8cc   :  { %2827 = vmatpush3.bf16.msra.mxu0 %v2826_v29 }
 0x8cd   :  { %2828 = vmatprep.subr.bf16.mxu0 %v3174_v0 }
 0x8d0   :  { %2830 = vmatpush3.bf16.msra.mxu0 %v2829_v32 }
 0x8d1   :  { %2831 = vmatprep.subr.bf16.mxu0 %v3174_v0 }
 0x8d4   :  { %2833 = vmatpush3.bf16.msra.mxu0 %v2832_v34  ;;  %v2865_v34 = vpack.c.bf16 %v1601_v11, %v1600_v33  ;;  %v1805_v33 = vld [vmem:[#allocation11 + $0x1e0] sm:$0xff] }
 0x8d5   :  { %2834 = vmatprep.subr.bf16.mxu0 %v3174_v0 }
 0x8d8   :  { %2836 = vmatpush3.bf16.msra.mxu0 %v2835_v36  ;;  %v2868_v36 = vpack.c.bf16 %v1603_v19, %v1602_v35  ;;  %v1807_v19 = vld [vmem:[#allocation11 + $0x1f0] sm:$0xff] }
 0x8d9   :  { %2837 = vmatprep.subr.bf16.mxu0 %v3174_v0 }
 0x8dc   :  { %2839 = vmatpush3.bf16.msra.mxu0 %v2838_v25  ;;  %v2871_v25 = vpack.c.bf16 %v1605_v39, %v1604_v17 }
 0x8dd   :  { %2840 = vmatprep.subr.bf16.mxu0 %v3174_v0 }
 0x992   :  { %v1200_v22 = vpop.f32.mrb[14].mxu0 }
 0x993   :  { %v1202_v41 = vpop.f32.mrb[15].mxu0 }
 0x994   :  { %v1211_v42 = vmul.f32 %v1209_v40, %v1202_v41  ;;  %v1606_v40 = vld [vmem:[#allocation11 + $0x130] sm:$0xff] }
 0x996   :  { %v1212_v43 = vadd.f32 %v1211_v42, %v1200_v22  ;;  %v1607_v22 = vld [vmem:[#allocation11 + $0x138] sm:$0xff]  ;;  %v1608_v42 = vld [vmem:[#allocation11 + $0x140] sm:$0xff] }
 0x997   :  { %v2874_v41 = vpack.c.bf16 %v1607_v22, %v1606_v40 }
 0x998   :  { %2490 = vmatmul.mubr.f32.vlgmr.msra.gmra.mrb[16].mxu0 %v1212_v43  ;;  %v1609_v43 = vld [vmem:[#allocation11 + $0x148] sm:$0xff] }
 0x999   :  { %2524 = vmatprep.mubr.msk.f32.mxu0 %vm3175_vm0, %v3176_v1  ;;  %2842 = vmatpush3.bf16.msra.mxu0 %v2841_v50  ;;  %v1613_v50 = vld [vmem:[#allocation11 + $0x168] sm:$0xff] }
 0x99a   :  { %2843 = vmatprep.subr.bf16.mxu0 %v3174_v0  ;;  %v2883_v51 = vpack.c.bf16 %v1613_v50, %v1612_v48  ;;  %v2125_v48 = vld [vmem:[%s3761_s11 + $0x2] ss:$0 sm:$0xff] }
 0x99b   :  { %v2126_v50 = vld [vmem:[%s3762_s12 + $0x2] ss:$0 sm:$0xff] }
 0x99d   :  { %2845 = vmatpush3.bf16.msra.mxu0 %v2844_v53  ;;  %v1615_v53 = vld [vmem:[#allocation11 + $0x178] sm:$0xff] }
 0x99e   :  { %2846 = vmatprep.subr.bf16.mxu0 %v3174_v0  ;;  %v2886_v54 = vpack.c.bf16 %v1615_v53, %v1614_v52 }
 0x9a1   :  { %2848 = vmatpush3.bf16.msra.mxu0 %v2847_v56 }
 0x9a2   :  { %2849 = vmatprep.subr.bf16.mxu0 %v3174_v0 }
 0x9a5   :  { %2851 = vmatpush3.bf16.msra.mxu0 %v2850_v59 }
 0x9a6   :  { %2852 = vmatprep.subr.bf16.mxu0 %v3174_v0 }
 0x9a9   :  { %2854 = vmatpush3.bf16.msra.mxu0 %v2853_v62 }
 0x9aa   :  { %2855 = vmatprep.subr.bf16.mxu0 %v3174_v0 }
 0x9ad   :  { %2857 = vmatpush3.bf16.msra.mxu0 %v2856_v4 }
 0x9ae   :  { %2858 = vmatprep.subr.bf16.mxu0 %v3174_v0 }
 0x9b1   :  { %2860 = vmatpush3.bf16.msra.mxu0 %v2859_v6 }
 0x9b2   :  { %2861 = vmatprep.subr.bf16.mxu0 %v3174_v0 }
 0x9b5   :  { %2863 = vmatpush3.bf16.msra.mxu0 %v2862_v8 }
 0xa6b   :  { %v1295_v44 = vpop.f32.mrb[16].mxu0 }
 0xa6c   :  { %v1301_v45 = vmul.f32 %v1295_v44, %v1295_v44  ;;  %v2491_v46 = vpop.f32.mrb[17].mxu0 }
 0xa6d   :  { %v1611_v46 = vld [vmem:[#allocation11 + $0x158] sm:$0xff] }
 0xa6e   :  { %1305 = vmatprep.subr.mxu1 %v1301_v45  ;;  %v1610_v45 = vld [vmem:[#allocation11 + $0x150] sm:$0xff] }
 0xa6f   :  { %1306 = vmatpush1.msra.mxu1 %v1295_v44  ;;  %v2880_v49 = vpack.c.bf16 %v1611_v46, %v1610_v45 }
 0xa70   :  { %2114 = vmatmul.mubr.msk.f32.vlgmr.msra.gmra.mrb[18].mxu1 %vm220_vm1, %v3179_v47 }
 0xa71   :  { %1562 = vmatprep.mubr.f32.mxu1 %v3176_v1 }
 0xb43   :  { %v1371_v9 = vpop.f32.mrb[18].mxu1 }
 0xb44   :  { %v1376_v10 = vmul.f32 %v1371_v9, %v1371_v9  ;;  %v1382_v12 = vrot.slane %v1371_v9, %v3412_v38  ;;  %v1373_v13 = vpop.f32.mrb[19].mxu1 }
 0xb46   :  { %v1383_v14 = vsub.f32 %v1295_v44, %v1382_v12  ;;  %v1377_v15 = vsub.f32 %v1373_v13, %v1376_v10  ;;  %v2877_v44 = vpack.c.bf16 %v1609_v43, %v1608_v42  ;;  %v1793_v12 = vld [vmem:[#allocation11 + $0x180] sm:$0xff]  ;;  %v1794_v13 = vld [vmem:[#allocation11 + $0x188] sm:$0xff] }
 0xb48   :  { %v1378_v16 = vmax.f32 %v1377_v15, 0.0  ;;  %v1795_v15 = vld [vmem:[#allocation11 + $0x190] sm:$0xff] }
 0xb4a   :  { %v1384_v18 = vadd.f32 1e-05, %v1378_v16  ;;  %v1796_v16 = vld [vmem:[#allocation11 + $0x198] sm:$0xff] }
 0xb4c   :  { %2984 = vrsqrt.f32 %v1384_v18  ;;  %v2892_v18 = vpack.c.bf16 %v1796_v16, %v1795_v15  ;;  %v2000_v15 = vld [vmem:[%s3763_s13 + $0x78] sm:$0xff] }
 0xb56   :  { %v2985_v20 = vpop.eup %2984 }
 0xb57   :  { %v1389_v21 = vrot.slane %v2985_v20, %v3412_v38  ;;  %v1797_v20 = vld [vmem:[#allocation11 + $0x1a0] sm:$0xff] }
 0xb59   :  { %v1390_v24 = vmul.f32 %v1389_v21, %v1383_v14  ;;  %v2889_v14 = vpack.c.bf16 %v1794_v13, %v1793_v12  ;;  %v1798_v21 = vld [vmem:[#allocation11 + $0x1a8] sm:$0xff]  ;;  %v1998_v12 = vld [vmem:[%s3763_s13 + $0x68] sm:$0xff] }
 0xb5b   :  { %v1397_v27 = vmul.f32 %v2115_v23, %v1390_v24  ;;  %v2895_v23 = vpack.c.bf16 %v1798_v21, %v1797_v20  ;;  %v1799_v24 = vld [vmem:[#allocation11 + $0x1b0] sm:$0xff] }
 0xb5d   :  { %v1404_v28 = vadd.f32 %v2116_v26, %v1397_v27  ;;  %v1800_v26 = vld [vmem:[#allocation11 + $0x1b8] sm:$0xff] }
 0xb5e   :  { %v2898_v27 = vpack.c.bf16 %v1800_v26, %v1799_v24 }
 0xb5f   :  { %2986 = vtanh.f32 %v1404_v28  ;;  %v1801_v28 = vld [vmem:[#allocation11 + $0x1c0] sm:$0xff] }
 0xb69   :  { %v2987_v29 = vpop.eup %2986 }
 0xb6a   :  { %2525 = vmatmul.mubr.f32.vlgmr.msra.gmra.mrb[18].mxu0 %v2987_v29  ;;  %v1802_v29 = vld [vmem:[#allocation11 + $0x1c8] sm:$0xff] }
 0xb6b   :  { %1755 = vmatprep.mubr.f32.mxu0 %v3176_v1 }
 0xc3d   :  { %v1489_v30 = vpop.f32.mrb[18].mxu0 }
 0xc3e   :  { %v1497_v31 = vmul.f32 %v1489_v30, %v1489_v30  ;;  %v2526_v32 = vpop.f32.mrb[19].mxu0 }
 0xc3f   :  { %v1804_v32 = vld [vmem:[#allocation11 + $0x1d8] sm:$0xff] }
 0xc40   :  { %1498 = vmatprep.subr.mxu1 %v1497_v31  ;;  %v1803_v31 = vld [vmem:[#allocation11 + $0x1d0] sm:$0xff] }
 0xc41   :  { %1499 = vmatpush1.msra.mxu1 %v1489_v30  ;;  %v2904_v11 = vpack.c.bf16 %v1804_v32, %v1803_v31  ;;  %v2130_v31 = vld [vmem:[%s3761_s11 + $0x3] ss:$0 sm:$0xff]  ;;  %s3132_s11 = scalar_lea.vmem %s2087_s6, 128 }
 0xc42   :  { %2119 = vmatmul.mubr.msk.f32.vlgmr.msra.gmra.mrb[20].mxu1 %vm220_vm1, %v3179_v47  ;;  %2864 = vmatprep.subr.bf16.mxu1 %v3174_v0  ;;  %p3133_p6 = scmp.ne.s32.totalorder %s2087_s6, %s3132_s11  ;;  %p3138_p8 = scmp.lt.s32.totalorder %s3132_s11, %s3132_s11 }
 0xc43   :  { %2559 = vmatprep.mubr.msk.f32.mxu1 %vm3175_vm0, %v3176_v1  ;;  %2866 = vmatpush3.bf16.msra.mxu1 %v2865_v34  ;;  %v1806_v34 = vld [vmem:[#allocation11 + $0x1e8] sm:$0xff] }
 0xc44   :  { %2867 = vmatprep.subr.bf16.mxu1 %v3174_v0  ;;  %v2907_v35 = vpack.c.bf16 %v1806_v34, %v1805_v33  ;;  %p3139_p9 = por %p3138_p8, %p3137_p7 }
 0xc46   :  { %p3140_p10 = pnand %p3139_p9, %p3133_p6 }
 0xc47   :  { %2869 = vmatpush3.bf16.msra.mxu1 %v2868_v36  ;;  %v1808_v36 = vld [vmem:[#allocation11 + $0x1f8] sm:$0xff] }
 0xc48   :  { %2870 = vmatprep.subr.bf16.mxu1 %v3174_v0  ;;  %v2910_v17 = vpack.c.bf16 %v1808_v36, %v1807_v19 }
 0xc4b   :  { %2872 = vmatpush3.bf16.msra.mxu1 %v2871_v25 }
 0xc4c   :  { %2873 = vmatprep.subr.bf16.mxu1 %v3174_v0 }
 0xc4f   :  { %2875 = vmatpush3.bf16.msra.mxu1 %v2874_v41 }
 0xc50   :  { %2876 = vmatprep.subr.bf16.mxu1 %v3174_v0 }
 0xc53   :  { %2878 = vmatpush3.bf16.msra.mxu1 %v2877_v44 }
 0xc54   :  { %2879 = vmatprep.subr.bf16.mxu1 %v3174_v0 }
 0xc57   :  { %2881 = vmatpush3.bf16.msra.mxu1 %v2880_v49 }
 0xc58   :  { %2882 = vmatprep.subr.bf16.mxu1 %v3174_v0 }
 0xc5b   :  { %2884 = vmatpush3.bf16.msra.mxu1 %v2883_v51 }
 0xc5c   :  { %2885 = vmatprep.subr.bf16.mxu1 %v3174_v0 }
 0xc5f   :  { %2887 = vmatpush3.bf16.msra.mxu1 %v2886_v54 }
 0xd15   :  { %v1564_v55 = vpop.f32.mrb[20].mxu1 }
 0xd16   :  { %v1569_v56 = vmul.f32 %v1564_v55, %v1564_v55  ;;  %v1575_v57 = vrot.slane %v1564_v55, %v3412_v38  ;;  %v1566_v58 = vpop.f32.mrb[21].mxu1 }
 0xd18   :  { %v1576_v59 = vsub.f32 %v1489_v30, %v1575_v57  ;;  %v1570_v60 = vsub.f32 %v1566_v58, %v1569_v56  ;;  %v2901_v30 = vpack.c.bf16 %v1802_v29, %v1801_v28  ;;  %v1985_v57 = vld [vmem:[%s3763_s13] sm:$0xff]  ;;  %v1986_v58 = vld [vmem:[%s3763_s13 + $0x8] sm:$0xff] }
 0xd1a   :  { %v1571_v61 = vmax.f32 %v1570_v60, 0.0 }
 0xd1c   :  { %v1577_v62 = vadd.f32 1e-05, %v1571_v61  ;;  %v1989_v61 = vld [vmem:[%s3763_s13 + $0x20] sm:$0xff] }
 0xd1e   :  { %2988 = vrsqrt.f32 %v1577_v62  ;;  %v1990_v62 = vld [vmem:[%s3763_s13 + $0x28] sm:$0xff] }
 0xd28   :  { %v2989_v63 = vpop.eup %2988 }
 0xd29   :  { %v1582_v2 = vrot.slane %v2989_v63, %v3412_v38  ;;  %v2919_v63 = vpack.c.bf16 %v1990_v62, %v1989_v61 }
 0xd2b   :  { %v1583_v4 = vmul.f32 %v1582_v2, %v1576_v59  ;;  %v2913_v59 = vpack.c.bf16 %v1986_v58, %v1985_v57  ;;  %v1991_v2 = vld [vmem:[%s3763_s13 + $0x30] sm:$0xff] }
 0xd2d   :  { %v1590_v6 = vmul.f32 %v2120_v3, %v1583_v4  ;;  %v1992_v3 = vld [vmem:[%s3763_s13 + $0x38] sm:$0xff] }
 0xd2e   :  { %v2922_v4 = vpack.c.bf16 %v1992_v3, %v1991_v2 }
 0xd2f   :  { %v1597_v37 = vadd.f32 %v2121_v5, %v1590_v6  ;;  %v1993_v5 = vld [vmem:[%s3763_s13 + $0x40] sm:$0xff]  ;;  %v1994_v6 = vld [vmem:[%s3763_s13 + $0x48] sm:$0xff] }
 0xd31   :  { %2990 = vtanh.f32 %v1597_v37  ;;  %v2925_v37 = vpack.c.bf16 %v1994_v6, %v1993_v5 }
 0xd3b   :  { %v2991_v7 = vpop.eup %2990 }
 0xd3c   :  { %2560 = vmatmul.mubr.f32.vlgmr.msra.gmra.mrb[22].mxu1 %v2991_v7  ;;  %v1995_v7 = vld [vmem:[%s3763_s13 + $0x50] sm:$0xff] }
 0xd3d   :  { %1948 = vmatprep.mubr.f32.mxu1 %v3176_v1 }
 0xe0f   :  { %v1682_v8 = vpop.f32.mrb[22].mxu1 }
 0xe10   :  { %v1690_v9 = vmul.f32 %v1682_v8, %v1682_v8  ;;  %v2561_v10 = vpop.f32.mrb[23].mxu1 }
 0xe12   :  { %1691 = vmatprep.subr.mxu0 %v1690_v9  ;;  %v1997_v9 = vld [vmem:[%s3763_s13 + $0x60] sm:$0xff] }
 0xe13   :  { %1692 = vmatpush1.msra.mxu0 %v1682_v8  ;;  %v2931_v13 = vpack.c.bf16 %v1998_v12, %v1997_v9 }
 0xe14   :  { %2124 = vmatmul.mubr.msk.f32.vlgmr.msra.gmra.mrb[20].mxu0 %vm220_vm1, %v3179_v47  ;;  %2888 = vmatprep.subr.bf16.mxu0 %v3174_v0 }
 0xe15   :  { %2594 = vmatprep.mubr.msk.f32.mxu0 %vm3175_vm0, %v3176_v1  ;;  %2890 = vmatpush3.bf16.msra.mxu0 %v2889_v14  ;;  %v1999_v14 = vld [vmem:[%s3763_s13 + $0x70] sm:$0xff] }
 0xe16   :  { %2891 = vmatprep.subr.bf16.mxu0 %v3174_v0  ;;  %v2934_v16 = vpack.c.bf16 %v2000_v15, %v1999_v14 }
 0xe19   :  { %2893 = vmatpush3.bf16.msra.mxu0 %v2892_v18 }
 0xe1a   :  { %2894 = vmatprep.subr.bf16.mxu0 %v3174_v0 }
 0xe1d   :  { %2896 = vmatpush3.bf16.msra.mxu0 %v2895_v23 }
 0xe1e   :  { %2897 = vmatprep.subr.bf16.mxu0 %v3174_v0 }
 0xe21   :  { %2899 = vmatpush3.bf16.msra.mxu0 %v2898_v27 }
 0xe22   :  { %2900 = vmatprep.subr.bf16.mxu0 %v3174_v0 }
 0xe25   :  { %2902 = vmatpush3.bf16.msra.mxu0 %v2901_v30 }
 0xe26   :  { %2903 = vmatprep.subr.bf16.mxu0 %v3174_v0 }
 0xe29   :  { %2905 = vmatpush3.bf16.msra.mxu0 %v2904_v11 }
 0xe2a   :  { %2906 = vmatprep.subr.bf16.mxu0 %v3174_v0 }
 0xe2d   :  { %2908 = vmatpush3.bf16.msra.mxu0 %v2907_v35  ;;  %v2132_v35 = vld [vmem:[%s3764_s14] ss:$0 sm:$0xff] }
 0xe2e   :  { %2909 = vmatprep.subr.bf16.mxu0 %v3174_v0 }
 0xe31   :  { %2911 = vmatpush3.bf16.msra.mxu0 %v2910_v17 }
 0xee7   :  { %v1757_v39 = vpop.f32.mrb[20].mxu0 }
 0xee8   :  { %v1762_v25 = vmul.f32 %v1757_v39, %v1757_v39  ;;  %v1768_v40 = vrot.slane %v1757_v39, %v3412_v38  ;;  %v1759_v22 = vpop.f32.mrb[21].mxu0 }
 0xeea   :  { %v1769_v41 = vsub.f32 %v1682_v8, %v1768_v40  ;;  %v1763_v42 = vsub.f32 %v1759_v22, %v1762_v25  ;;  %v1996_v8 = vld [vmem:[%s3763_s13 + $0x58] sm:$0xff] }
 0xeeb   :  { %v2928_v10 = vpack.c.bf16 %v1996_v8, %v1995_v7 }
 0xeec   :  { %v1764_v43 = vmax.f32 %v1763_v42, 0.0 }
 0xeee   :  { %v1770_v44 = vadd.f32 1e-05, %v1764_v43 }
 0xef0   :  { %2992 = vrsqrt.f32 %v1770_v44 }
 0xefa   :  { %v2993_v45 = vpop.eup %2992 }
 0xefb   :  { %v1775_v46 = vrot.slane %v2993_v45, %v3412_v38 }
 0xefd   :  { %v1776_v49 = vmul.f32 %v1775_v46, %v1769_v41 }
 0xeff   :  { %v1783_v51 = vmul.f32 %v2125_v48, %v1776_v49 }
 0xf01   :  { %v1790_v52 = vadd.f32 %v2126_v50, %v1783_v51 }
 0xf03   :  { %2994 = vtanh.f32 %v1790_v52 }
 0xf0d   :  { %v2995_v53 = vpop.eup %2994 }
 0xf0e   :  { %2595 = vmatmul.mubr.f32.vlgmr.msra.gmra.mrb[22].mxu0 %v2995_v53 }
 0xfe1   :  { %v1875_v54 = vpop.f32.mrb[22].mxu0 }
 0xfe2   :  { %v1883_v55 = vmul.f32 %v1875_v54, %v1875_v54  ;;  %v2596_v56 = vpop.f32.mrb[23].mxu0 }
 0xfe4   :  { %1884 = vmatprep.subr.mxu1 %v1883_v55 }
 0xfe5   :  { %1885 = vmatpush1.msra.mxu1 %v1875_v54 }
 0xfe6   :  { %2129 = vmatmul.mubr.msk.f32.vlgmr.msra.gmra.mrb[24].mxu1 %vm220_vm1, %v3179_v47  ;;  %2912 = vmatprep.subr.bf16.mxu1 %v3174_v0  ;;  %v1987_v47 = vld [vmem:[%s3763_s13 + $0x10] sm:$0xff] }
 0xfe7   :  { %2629 = vmatprep.mubr.msk.f32.mxu1 %vm3175_vm0, %v3176_v1  ;;  %2914 = vmatpush3.bf16.msra.mxu1 %v2913_v59  ;;  %v1988_v1 = vld [vmem:[%s3763_s13 + $0x18] sm:$0xff] }
 0xfe8   :  { %2915 = vmatprep.subr.bf16.mxu1 %v3174_v0  ;;  %v2916_v60 = vpack.c.bf16 %v1988_v1, %v1987_v47 }
 0xfeb   :  { %2917 = vmatpush3.bf16.msra.mxu1 %v2916_v60 }
 0xfec   :  { %2918 = vmatprep.subr.bf16.mxu1 %v3174_v0 }
 0xfef   :  { %2920 = vmatpush3.bf16.msra.mxu1 %v2919_v63 }
 0xff0   :  { %2921 = vmatprep.subr.bf16.mxu1 %v3174_v0 }
 0xff3   :  { %2923 = vmatpush3.bf16.msra.mxu1 %v2922_v4 }
 0xff4   :  { %2924 = vmatprep.subr.bf16.mxu1 %v3174_v0 }
 0xff7   :  { %2926 = vmatpush3.bf16.msra.mxu1 %v2925_v37 }
 0xff8   :  { %2927 = vmatprep.subr.bf16.mxu1 %v3174_v0 }
 0xffb   :  { %2929 = vmatpush3.bf16.msra.mxu1 %v2928_v10 }
 0xffc   :  { %2930 = vmatprep.subr.bf16.mxu1 %v3174_v0 }
 0xfff   :  { %2932 = vmatpush3.bf16.msra.mxu1 %v2931_v13 }
0x1000   :  { %2933 = vmatprep.subr.bf16.mxu1 %v3174_v0  ;;  %v2131_v0 = vld [vmem:[%s3762_s12 + $0x3] ss:$0 sm:$0xff] }
0x1003   :  { %2935 = vmatpush3.bf16.msra.mxu1 %v2934_v16 }
0x10b9   :  { %v1950_v18 = vpop.f32.mrb[24].mxu1 }
0x10ba   :  { %v1955_v20 = vmul.f32 %v1950_v18, %v1950_v18  ;;  %v1961_v21 = vrot.slane %v1950_v18, %v3412_v38  ;;  %v1952_v23 = vpop.f32.mrb[25].mxu1 }
0x10bc   :  { %v1962_v24 = vsub.f32 %v1875_v54, %v1961_v21  ;;  %v1956_v26 = vsub.f32 %v1952_v23, %v1955_v20 }
0x10be   :  { %v1957_v27 = vmax.f32 %v1956_v26, 0.0 }
0x10c0   :  { %v1963_v28 = vadd.f32 1e-05, %v1957_v27 }
0x10c2   :  { %2996 = vrsqrt.f32 %v1963_v28 }
0x10cc   :  { %v2997_v29 = vpop.eup %2996 }
0x10cd   :  { %v1968_v30 = vrot.slane %v2997_v29, %v3412_v38 }
0x10cf   :  { %v1969_v32 = vmul.f32 %v1968_v30, %v1962_v24 }
0x10d1   :  { %v1976_v33 = vmul.f32 %v2130_v31, %v1969_v32 }
0x10d3   :  { %v1983_v11 = vadd.f32 %v2131_v0, %v1976_v33 }
0x10d5   :  { %2998 = vtanh.f32 %v1983_v11 }
0x10df   :  { %v2999_v34 = vpop.eup %2998 }
0x10e0   :  { %2630 = vmatmul.mubr.f32.vlgmr.msra.gmra.mrb[26].mxu1 %v2999_v34 }
0x11b3   :  { %v2074_v38 = vpop.f32.mrb[26].mxu1 }
0x11b4   :  { %v2075_v19 = vadd.f32 %v2132_v35, %v2074_v38  ;;  %v2631_v36 = vpop.f32.mrb[27].mxu1 }
0x11b6   :  { %2079 = vst.msk [vmem:[#allocation13] sm:$0xff] %vm2078_vm3, %v2075_v19 }
0x11b7   :  { %3143 = shalt.err (!%p3140_p10)
}
0x11b8   :  { %s3144_s3 = scalar_lea.hbm %s3765_s15, 128 }
0x11b9   :  { %p3145_p11 = scmp.ne.s32.totalorder %s3765_s15, %s3144_s3  ;;  %p3148_p12 = scmp.lt.u32.totalorder %s3144_s3, %s3765_s15 }
0x11bb   :  { %p3150_p13 = pnand %p3148_p12, %p3145_p11 }
0x11bd   :  { %3153 = shalt.err (!%p3150_p13)
}
0x11be   :  { %2089 = dma.vmem_to_hbm [thread:$0]  %s2087_s6, 128, %s3765_s15, [#allocation4]  }
0x11bf   :  { %3162 = dma.done.wait [#allocation4], 128  }
0x11c0   :  { %3163 = vsyncadd [#allocation4], 4294967168 }
0x11c1   :  { %2093 = vsyncpa [#allocation3], 1 }
0x11c2   :  { %2094 = vsyncpa [#allocation6], 1 }
0x11c3   :  { %2095 = vsyncpa [#allocation9], 1 }
0x11c4   :  { %2096 = vsyncpa [#allocation12], 1 }
0x11c5   :  { %2097 = vsyncpa [#allocation4], 1 }

</bundles_post_ra>
